<compile_context>
chip_gen: v5e
topology: v5e:2x2
jax: 0.10.0
libtpu: 0.0.40
codegen_flags: <defaults>
</compile_context>

<pallas_src>
import jax
import jax.numpy as jnp
from jax.experimental import pallas as pl
from jax.experimental.pallas import tpu as pltpu


# ----------------------------- Pallas kernel ------------------------------ #
def _conv1x1net_kernel(alpha_ref, x_ref,
                       w1_ref, b1_ref, w2_ref, b2_ref,
                       w3_ref, b3_ref, w4_ref, b4_ref, o_ref):
    """One (batch, pixel-tile): 4 x (1x1 conv + bias + PReLU), fully fused.

    x_ref   : (1, Cin, TP)   bf16 activations, TP pixels on the lane dim (VMEM)
    wK_ref  : (CoutK, CinK)  bf16 1x1-conv weights, stationary across the grid
    bK_ref  : (CoutK, 1)     f32 bias column vectors (broadcast over pixels)
    alpha_ref : (1,)         shared PReLU slope (SMEM scalar)
    o_ref   : (1, Cout, TP)  f32 output (VMEM), lane-dense last dim
    """
    alpha = alpha_ref[0]

    def layer(h_bf16, w_ref, b_ref):
        # (Cout, Cin) @ (Cin, TP) on the MXU, f32 accumulation.
        y = jnp.dot(w_ref[...], h_bf16, preferred_element_type=jnp.float32)
        y = y + b_ref[...]                          # (Cout, 1) broadcast over TP
        return jnp.where(y > 0, y, alpha * y)       # PReLU (single shared slope)

    h = x_ref[0]                                    # (Cin, TP) bf16
    h = layer(h, w1_ref, b1_ref).astype(jnp.bfloat16)
    h = layer(h, w2_ref, b2_ref).astype(jnp.bfloat16)
    h = layer(h, w3_ref, b3_ref).astype(jnp.bfloat16)
    h = layer(h, w4_ref, b4_ref)                    # final epilogue stays f32
    o_ref[0] = h                                    # lane-dense (Cout, TP) store


def _pick_pixel_tile(P):
    """Largest lane-dense pixel tile (multiple of 128) that divides P."""
    for tp in (512, 256, 128):
        if P % tp == 0:
            return tp
    return P  # small / irregular spatial: single full-extent tile


def conv1x1net_forward(x_nchw, params, alpha):
    """Matches Conv1x1Net.forward(x) with up_down=None.  Input/Output: NCHW."""
    N, Cin, H, W = x_nchw.shape
    P = H * W
    (w1, b1), (w2, b2), (w3, b3), (w4, b4) = params
    Cout = w4.shape[0]

    TP = _pick_pixel_tile(P)
    n_pt = P // TP

    # NCHW flattened is already the (C, H*W) layout the kernel wants.
    # Cast to bf16 here (same numerics as casting in-kernel, half the DMA bytes).
    x = x_nchw.reshape(N, Cin, P).astype(jnp.bfloat16)

    def prep_w(w):  # bf16 matmul operand (halves weight bytes, MXU bf16 path)
        return w.astype(jnp.bfloat16)

    def prep_b(b):  # f32 column vector, broadcast over the pixel (lane) dim
        return b.reshape(-1, 1).astype(jnp.float32)

    alpha1 = jnp.asarray(alpha, jnp.float32).reshape(1)

    def w_spec(w):   # weights stationary: constant block index -> fetched once
        return pl.BlockSpec(w.shape, lambda n, p: (0, 0))

    def b_spec(w):
        return pl.BlockSpec((w.shape[0], 1), lambda n, p: (0, 0))

    out = pl.pallas_call(
        _conv1x1net_kernel,
        out_shape=jax.ShapeDtypeStruct((N, Cout, P), jnp.float32),
        grid=(N, n_pt),
        in_specs=[
            pl.BlockSpec(memory_space=pltpu.SMEM),                    # alpha
            pl.BlockSpec((1, Cin, TP), lambda n, p: (n, 0, p)),       # x
            w_spec(w1), b_spec(w1),                                   # conv1
            w_spec(w2), b_spec(w2),                                   # conv2
            w_spec(w3), b_spec(w3),                                   # conv3
            w_spec(w4), b_spec(w4),                                   # conv4
        ],
        out_specs=pl.BlockSpec((1, Cout, TP), lambda n, p: (n, 0, p)),
        compiler_params=pltpu.CompilerParams(
            dimension_semantics=("parallel", "parallel")),  # megacore sharding
    )(alpha1, x,
      prep_w(w1), prep_b(b1), prep_w(w2), prep_b(b2),
      prep_w(w3), prep_b(b3), prep_w(w4), prep_b(b4))

    return out.reshape(N, Cout, H, W)               # already NCHW


# --------------------------- parameter setup ------------------------------ #
def make_weightnorm_conv1x1_params(key, cin, cout):
    """Deterministic init mimicking nn.Conv2d(k=1) default + weight_norm.

    Returns (w, bias) with w shaped (cout, cin) -- the 1x1 conv weight with
    the trivial spatial dims squeezed out.
    """
    kv, kg, kb = jax.random.split(key, 3)
    fan_in = cin  # kernel_size = 1
    bound = 1.0 / jnp.sqrt(fan_in)
    # v : (Cout, Cin)  (PyTorch OIHW with 1x1 spatial squeezed)
    v = jax.random.uniform(kv, (cout, cin), jnp.float32, -bound, bound)
    # weight_norm: w = g * v / ||v||   (norm over (Cin, kH, kW), dim=0)
    v_norm = jnp.sqrt(jnp.sum(v * v, axis=1, keepdims=True))
    # g is initialized to ||v|| by weight_norm; perturb slightly so wn matters.
    g = v_norm * (1.0 + 0.1 * jax.random.normal(kg, (cout, 1), jnp.float32))
    w = g * v / v_norm
    bias = jax.random.uniform(kb, (cout,), jnp.float32, -bound, bound)
    return w, bias


# ----------------------------- pure-JAX reference ------------------------- #
def conv1x1net_reference(x_nchw, params, alpha):
    N, Cin, H, W = x_nchw.shape
    h = x_nchw.reshape(N, Cin, H * W).astype(jnp.float32)
    for (w, b) in params:
        y = jnp.einsum("oc,ncp->nop", w, h) + b[None, :, None]
        h = jnp.where(y > 0, y, alpha * y)
    return h.reshape(N, -1, H, W)


if __name__ == "__main__":
    # Small shapes implied by the module: batch=2, in_dim=4, out_dim=4,
    # spatial=16x16, hidden=128.
    in_dim, out_dim, hidden = 4, 4, 128
    N, H, W = 2, 16, 16

    root = jax.random.PRNGKey(0)
    kx, k1, k2, k3, k4 = jax.random.split(root, 5)

    x = jax.random.normal(kx, (N, in_dim, H, W), jnp.float32)   # NCHW like torch

    params = [
        make_weightnorm_conv1x1_params(k1, in_dim, hidden),   # conv1
        make_weightnorm_conv1x1_params(k2, hidden, hidden),   # conv2
        make_weightnorm_conv1x1_params(k3, hidden, hidden),   # conv3
        make_weightnorm_conv1x1_params(k4, hidden, out_dim),  # conv4
    ]
    prelu_alpha = jnp.float32(0.25)   # nn.PReLU() default init

    fwd = jax.jit(lambda xx: conv1x1net_forward(xx, params, prelu_alpha))
    out = jax.block_until_ready(fwd(x))

    assert out.shape == (N, out_dim, H, W), out.shape
    assert bool(jnp.all(jnp.isfinite(out)))

    # Correctness vs. pure-JAX f32 reference (loose tol: matmuls run in bf16).
    ref = conv1x1net_reference(x, params, prelu_alpha)
    max_err = float(jnp.max(jnp.abs(out - ref)))
    scale = float(jnp.max(jnp.abs(ref))) + 1e-6
    assert max_err < 5e-2 * scale, (max_err, scale)

    print("KERNEL_OK")
</pallas_src>

<mosaic_0001>
module attributes {stable_mosaic.version = 11 : i64} {
  func.func @_conv1x1net_kernel(%arg0: i32, %arg1: i32, %arg2: memref<1xf32, #tpu.memory_space<smem>>, %arg3: memref<1x4x256xbf16, #tpu.memory_space<vmem>>, %arg4: memref<128x4xbf16, #tpu.memory_space<vmem>>, %arg5: memref<128x1xf32, #tpu.memory_space<vmem>>, %arg6: memref<128x128xbf16, #tpu.memory_space<vmem>>, %arg7: memref<128x1xf32, #tpu.memory_space<vmem>>, %arg8: memref<128x128xbf16, #tpu.memory_space<vmem>>, %arg9: memref<128x1xf32, #tpu.memory_space<vmem>>, %arg10: memref<4x128xbf16, #tpu.memory_space<vmem>>, %arg11: memref<4x1xf32, #tpu.memory_space<vmem>>, %arg12: memref<1x4x256xf32, #tpu.memory_space<vmem>>) attributes {dimension_semantics = [#tpu.dimension_semantics<parallel>, #tpu.dimension_semantics<parallel>], iteration_bounds = array<i64: 2, 1>, scalar_prefetch = 0 : i64, scratch_operands = 0 : i64, tpu.core_type = #tpu.core_type<tc>, window_params = [{transform_indices = @transform_0, window_bounds = array<i64: 1>}, {transform_indices = @transform_1, window_bounds = array<i64: 1, 4, 256>}, {pipeline_mode = #tpu.pipeline_mode<synchronous>, transform_indices = @transform_2, window_bounds = array<i64: 128, 4>}, {pipeline_mode = #tpu.pipeline_mode<synchronous>, transform_indices = @transform_3, window_bounds = array<i64: 128, 1>}, {pipeline_mode = #tpu.pipeline_mode<synchronous>, transform_indices = @transform_4, window_bounds = array<i64: 128, 128>}, {pipeline_mode = #tpu.pipeline_mode<synchronous>, transform_indices = @transform_5, window_bounds = array<i64: 128, 1>}, {pipeline_mode = #tpu.pipeline_mode<synchronous>, transform_indices = @transform_6, window_bounds = array<i64: 128, 128>}, {pipeline_mode = #tpu.pipeline_mode<synchronous>, transform_indices = @transform_7, window_bounds = array<i64: 128, 1>}, {pipeline_mode = #tpu.pipeline_mode<synchronous>, transform_indices = @transform_8, window_bounds = array<i64: 4, 128>}, {pipeline_mode = #tpu.pipeline_mode<synchronous>, transform_indices = @transform_9, window_bounds = array<i64: 4, 1>}, {transform_indices = @transform_10, window_bounds = array<i64: 1, 4, 256>}]} {
    %c0 = arith.constant 0 : index
    %0 = memref.load %arg2[%c0] : memref<1xf32, #tpu.memory_space<smem>>
    %c0_0 = arith.constant 0 : index
    %c0_1 = arith.constant 0 : index
    %c0_2 = arith.constant 0 : index
    %1 = vector.load %arg3[%c0_0, %c0_1, %c0_2] : memref<1x4x256xbf16, #tpu.memory_space<vmem>>, vector<1x4x256xbf16>
    %2 = vector.shape_cast %1 : vector<1x4x256xbf16> to vector<4x256xbf16>
    %c0_3 = arith.constant 0 : index
    %c0_4 = arith.constant 0 : index
    %3 = vector.load %arg4[%c0_3, %c0_4] : memref<128x4xbf16, #tpu.memory_space<vmem>>, vector<128x4xbf16>
    %cst = arith.constant dense<0.000000e+00> : vector<128x256xf32>
    %4 = tpu.matmul %3, %2, %cst {dimension_numbers = #tpu.dot_dimension_numbers<[1], [0], [0], [1], [0, 0, 1, 1], [], []>} : vector<128x4xbf16>, vector<4x256xbf16>, vector<128x256xf32> -> vector<128x256xf32>
    %c0_5 = arith.constant 0 : index
    %c0_6 = arith.constant 0 : index
    %5 = vector.load %arg5[%c0_5, %c0_6] : memref<128x1xf32, #tpu.memory_space<vmem>>, vector<128x1xf32>
    %6 = vector.broadcast %5 : vector<128x1xf32> to vector<128x256xf32>
    %7 = arith.addf %4, %6 : vector<128x256xf32>
    %cst_7 = arith.constant 0.000000e+00 : f32
    %8 = vector.broadcast %cst_7 : f32 to vector<128x256xf32>
    %9 = arith.cmpf ogt, %7, %8 : vector<128x256xf32>
    %10 = vector.broadcast %0 : f32 to vector<128x256xf32>
    %11 = arith.mulf %10, %7 : vector<128x256xf32>
    %12 = arith.select %9, %7, %11 : vector<128x256xi1>, vector<128x256xf32>
    %13 = arith.truncf %12 : vector<128x256xf32> to vector<128x256xbf16>
    %c0_8 = arith.constant 0 : index
    %c0_9 = arith.constant 0 : index
    %14 = vector.load %arg6[%c0_8, %c0_9] : memref<128x128xbf16, #tpu.memory_space<vmem>>, vector<128x128xbf16>
    %cst_10 = arith.constant dense<0.000000e+00> : vector<128x256xf32>
    %15 = tpu.matmul %14, %13, %cst_10 {dimension_numbers = #tpu.dot_dimension_numbers<[1], [0], [0], [1], [0, 0, 1, 1], [], []>} : vector<128x128xbf16>, vector<128x256xbf16>, vector<128x256xf32> -> vector<128x256xf32>
    %c0_11 = arith.constant 0 : index
    %c0_12 = arith.constant 0 : index
    %16 = vector.load %arg7[%c0_11, %c0_12] : memref<128x1xf32, #tpu.memory_space<vmem>>, vector<128x1xf32>
    %17 = vector.broadcast %16 : vector<128x1xf32> to vector<128x256xf32>
    %18 = arith.addf %15, %17 : vector<128x256xf32>
    %cst_13 = arith.constant 0.000000e+00 : f32
    %19 = vector.broadcast %cst_13 : f32 to vector<128x256xf32>
    %20 = arith.cmpf ogt, %18, %19 : vector<128x256xf32>
    %21 = vector.broadcast %0 : f32 to vector<128x256xf32>
    %22 = arith.mulf %21, %18 : vector<128x256xf32>
    %23 = arith.select %20, %18, %22 : vector<128x256xi1>, vector<128x256xf32>
    %24 = arith.truncf %23 : vector<128x256xf32> to vector<128x256xbf16>
    %c0_14 = arith.constant 0 : index
    %c0_15 = arith.constant 0 : index
    %25 = vector.load %arg8[%c0_14, %c0_15] : memref<128x128xbf16, #tpu.memory_space<vmem>>, vector<128x128xbf16>
    %cst_16 = arith.constant dense<0.000000e+00> : vector<128x256xf32>
    %26 = tpu.matmul %25, %24, %cst_16 {dimension_numbers = #tpu.dot_dimension_numbers<[1], [0], [0], [1], [0, 0, 1, 1], [], []>} : vector<128x128xbf16>, vector<128x256xbf16>, vector<128x256xf32> -> vector<128x256xf32>
    %c0_17 = arith.constant 0 : index
    %c0_18 = arith.constant 0 : index
    %27 = vector.load %arg9[%c0_17, %c0_18] : memref<128x1xf32, #tpu.memory_space<vmem>>, vector<128x1xf32>
    %28 = vector.broadcast %27 : vector<128x1xf32> to vector<128x256xf32>
    %29 = arith.addf %26, %28 : vector<128x256xf32>
    %cst_19 = arith.constant 0.000000e+00 : f32
    %30 = vector.broadcast %cst_19 : f32 to vector<128x256xf32>
    %31 = arith.cmpf ogt, %29, %30 : vector<128x256xf32>
    %32 = vector.broadcast %0 : f32 to vector<128x256xf32>
    %33 = arith.mulf %32, %29 : vector<128x256xf32>
    %34 = arith.select %31, %29, %33 : vector<128x256xi1>, vector<128x256xf32>
    %35 = arith.truncf %34 : vector<128x256xf32> to vector<128x256xbf16>
    %c0_20 = arith.constant 0 : index
    %c0_21 = arith.constant 0 : index
    %36 = vector.load %arg10[%c0_20, %c0_21] : memref<4x128xbf16, #tpu.memory_space<vmem>>, vector<4x128xbf16>
    %cst_22 = arith.constant dense<0.000000e+00> : vector<4x256xf32>
    %37 = tpu.matmul %36, %35, %cst_22 {dimension_numbers = #tpu.dot_dimension_numbers<[1], [0], [0], [1], [0, 0, 1, 1], [], []>} : vector<4x128xbf16>, vector<128x256xbf16>, vector<4x256xf32> -> vector<4x256xf32>
    %c0_23 = arith.constant 0 : index
    %c0_24 = arith.constant 0 : index
    %38 = vector.load %arg11[%c0_23, %c0_24] : memref<4x1xf32, #tpu.memory_space<vmem>>, vector<4x1xf32>
    %39 = vector.broadcast %38 : vector<4x1xf32> to vector<4x256xf32>
    %40 = arith.addf %37, %39 : vector<4x256xf32>
    %cst_25 = arith.constant 0.000000e+00 : f32
    %41 = vector.broadcast %cst_25 : f32 to vector<4x256xf32>
    %42 = arith.cmpf ogt, %40, %41 : vector<4x256xf32>
    %43 = vector.broadcast %0 : f32 to vector<4x256xf32>
    %44 = arith.mulf %43, %40 : vector<4x256xf32>
    %45 = arith.select %42, %40, %44 : vector<4x256xi1>, vector<4x256xf32>
    %c0_26 = arith.constant 0 : index
    %c0_27 = arith.constant 0 : index
    %c0_28 = arith.constant 0 : index
    %46 = vector.load %arg12[%c0_26, %c0_27, %c0_28] : memref<1x4x256xf32, #tpu.memory_space<vmem>>, vector<1x4x256xf32>
    %47 = vector.shape_cast %46 : vector<1x4x256xf32> to vector<4x256xf32>
    %48 = vector.shape_cast %45 : vector<4x256xf32> to vector<1x4x256xf32>
    tpu.vector_store %arg12[%c0_26, %c0_27, %c0_28], %48 {strides = array<i32>} : memref<1x4x256xf32, #tpu.memory_space<vmem>>, vector<1x4x256xf32>,
    return
  }
  func.func @transform_0(%arg0: i32, %arg1: i32) -> i32 {
    %c0_i32 = arith.constant 0 : i32
    %c0_i32_0 = arith.constant 0 : i32
    return %c0_i32 : i32
  }
  func.func @transform_1(%arg0: i32, %arg1: i32) -> (i32, i32, i32) {
    %c0_i32 = arith.constant 0 : i32
    %c0_i32_0 = arith.constant 0 : i32
    return %arg0, %c0_i32, %arg1 : i32, i32, i32
  }
  func.func @transform_2(%arg0: i32, %arg1: i32) -> (i32, i32) {
    %c0_i32 = arith.constant 0 : i32
    %c0_i32_0 = arith.constant 0 : i32
    %c0_i32_1 = arith.constant 0 : i32
    return %c0_i32, %c0_i32_0 : i32, i32
  }
  func.func @transform_3(%arg0: i32, %arg1: i32) -> (i32, i32) {
    %c0_i32 = arith.constant 0 : i32
    %c0_i32_0 = arith.constant 0 : i32
    %c0_i32_1 = arith.constant 0 : i32
    return %c0_i32, %c0_i32_0 : i32, i32
  }
  func.func @transform_4(%arg0: i32, %arg1: i32) -> (i32, i32) {
    %c0_i32 = arith.constant 0 : i32
    %c0_i32_0 = arith.constant 0 : i32
    %c0_i32_1 = arith.constant 0 : i32
    return %c0_i32, %c0_i32_0 : i32, i32
  }
  func.func @transform_5(%arg0: i32, %arg1: i32) -> (i32, i32) {
    %c0_i32 = arith.constant 0 : i32
    %c0_i32_0 = arith.constant 0 : i32
    %c0_i32_1 = arith.constant 0 : i32
    return %c0_i32, %c0_i32_0 : i32, i32
  }
  func.func @transform_6(%arg0: i32, %arg1: i32) -> (i32, i32) {
    %c0_i32 = arith.constant 0 : i32
    %c0_i32_0 = arith.constant 0 : i32
    %c0_i32_1 = arith.constant 0 : i32
    return %c0_i32, %c0_i32_0 : i32, i32
  }
  func.func @transform_7(%arg0: i32, %arg1: i32) -> (i32, i32) {
    %c0_i32 = arith.constant 0 : i32
    %c0_i32_0 = arith.constant 0 : i32
    %c0_i32_1 = arith.constant 0 : i32
    return %c0_i32, %c0_i32_0 : i32, i32
  }
  func.func @transform_8(%arg0: i32, %arg1: i32) -> (i32, i32) {
    %c0_i32 = arith.constant 0 : i32
    %c0_i32_0 = arith.constant 0 : i32
    %c0_i32_1 = arith.constant 0 : i32
    return %c0_i32, %c0_i32_0 : i32, i32
  }
  func.func @transform_9(%arg0: i32, %arg1: i32) -> (i32, i32) {
    %c0_i32 = arith.constant 0 : i32
    %c0_i32_0 = arith.constant 0 : i32
    %c0_i32_1 = arith.constant 0 : i32
    return %c0_i32, %c0_i32_0 : i32, i32
  }
  func.func @transform_10(%arg0: i32, %arg1: i32) -> (i32, i32, i32) {
    %c0_i32 = arith.constant 0 : i32
    %c0_i32_0 = arith.constant 0 : i32
    return %arg0, %c0_i32, %arg1 : i32, i32, i32
  }
}

</mosaic_0001>

<bundles_post_ra>
// kernel: _lambda_.1
= control target key start
LH: loop header
LB: loop body
LE: loop exit
PB: predicated region body
PF: predicated region fallthrough
CT: control target
= control target key end

     0   :  { %s2897_s0 = inlined_call_operand.<no memory space> [shape: f32[1], index: 0, kind: input, shape index: {}]   ;;  %s2898_s1 = inlined_call_operand.vmem [shape: bf16[2,4,256], index: 1, kind: input, shape index: {}]   ;;  %s2899_s2 = inlined_call_operand.hbm [shape: bf16[128,4], index: 2, kind: input, shape index: {}]   ;;  %s2900_s3 = inlined_call_operand.vmem [shape: f32[128,1], index: 3, kind: input, shape index: {}]   ;;  %s2901_s4 = inlined_call_operand.hbm [shape: bf16[128,128], index: 4, kind: input, shape index: {}]   ;;  %s2902_s5 = inlined_call_operand.vmem [shape: f32[128,1], index: 5, kind: input, shape index: {}]   ;;  %s2903_s6 = inlined_call_operand.hbm [shape: bf16[128,128], index: 6, kind: input, shape index: {}]   ;;  %s2904_s7 = inlined_call_operand.hbm [shape: f32[128,1], index: 7, kind: input, shape index: {}]   ;;  %s2905_s8 = inlined_call_operand.vmem [shape: bf16[4,128], index: 8, kind: input, shape index: {}]   ;;  %s2906_s9 = inlined_call_operand.vmem [shape: f32[4,1], index: 9, kind: input, shape index: {}]   ;;  %s2907_s10 = inlined_call_operand.vmem [shape: f32[2,4,256], index: 10, kind: output, shape index: {}]  }
   0x1   :  { %2908 = sst [smem:[#allocation13_spill]] %s2899_s2 }
   0x2   :  { %2909 = sst [smem:[#allocation14_spill]] %s2901_s4 }
   0x3   :  { %15 = sst [smem:[#allocation2]] %s2897_s0 }
   0x4   :  { %16 = vsyncpa [#allocation4], 0 }
   0x5   :  { %17 = vsyncpa [#allocation6], 0 }
   0x6   :  { %18 = vsyncpa [#allocation9], 0  ;;  %s2236_s15 = smov 0   ;;  %s2238_s16 = smov 0  }
   0x7   :  { %s2240_s17 = smov 0  }
   0x8 LB: > { %s1781_s0 = sadd.s32 4294967295, %s2167_s17   ;;  %p1783_p0 = scmp.ge.s32.totalorder %s2167_s17, 1  ;;  %s2167_s17 = sphi %s2240_s17, %s24_s17   ;;  %s2163_s16 = sphi %s2238_s16, %s2916_s16   ;;  %s2159_s15 = sphi %s2236_s15, %s2915_s15  }
   0x9   : > { %p286_p1 = scmp.lt.s32.totalorder %s2167_s17, 3  ;;  %p2254_p2 = scmp.eq.s32.totalorder %s1781_s0, 0 }
   0xa   : > { %s2911_s4 = sld [smem:[#allocation14_spill]]  ;;  %s2169_s23 = smov [#allocation5]  }
   0xb   : > { %p2261_p3 = pnand %p1783_p0, %p286_p1  ;;  %s319_s24 = sshll.u32 %s2169_s23, 4  ;;  %s320_s24 = int_to_ptr.vmem [resolvable:$true] %s319_s24 }
   0xc   : > { %s36_s26 = sadd.s32 1, %s2163_s16  ;;  %s2170_s27 = smov 64  }
   0xd   : > { %p1956_p4 = pneg %p2261_p3  ;;  %p38_p6 = scmp.ge.s32.totalorder %s36_s26, 2 }
   0xe   : > { %s2171_s28 = smov 4   ;;  %s2914_s2 = sld [smem:[#allocation13_spill]] }
   0xf   : > { %p2269_p5 = pnand %p2254_p2, %p1956_p4  ;;  %s2918_s26 = smov (%p38_p6, %s36_s26), 0 }
  0x10   : > { %s317_s21 = sshll.u32 %s2911_s4, 4  ;;  %s2172_s12 = smov [#allocation3]   ;;  %s318_s21 = int_to_ptr.hbm [resolvable:$true] %s317_s21 }
  0x11   : > { %1962 = dma.hbm_to_vmem [thread:$0]  (!%p2269_p5), %s318_s21, 1024, %s320_s24, [#allocation6], %s2170_s27, %s2170_s27, %s2171_s28  }
  0x12   : > { %s302_s13 = sshll.u32 %s2172_s12, 4  ;;  %s334_s19 = sshll.u32 %s2903_s6, 4  ;;  %s303_s13 = int_to_ptr.vmem [resolvable:$true] %s302_s13  ;;  %s335_s19 = int_to_ptr.hbm [resolvable:$true] %s334_s19 }
  0x13   : > { %s2173_s20 = smov [#allocation7]   ;;  %s348_s4 = sshll.u32 %s2904_s7, 4  ;;  %s349_s4 = int_to_ptr.hbm [resolvable:$true] %s348_s4 }
  0x14   : > { %s300_s11 = sshll.u32 %s2914_s2, 4  ;;  %s336_s21 = sshll.u32 %s2173_s20, 4  ;;  %s301_s11 = int_to_ptr.hbm [resolvable:$true] %s300_s11  ;;  %s337_s21 = int_to_ptr.vmem [resolvable:$true] %s336_s21 }
  0x15   : > { %1959 = dma.hbm_to_vmem [thread:$0]  (!%p2269_p5), %s301_s11, 1024, %s303_s13, [#allocation4], %s2170_s27, %s2170_s27, %s2171_s28  }
  0x16   : > { %1965 = dma.hbm_to_vmem [thread:$0]  (!%p2269_p5), %s335_s19, 1024, %s337_s21, [#allocation6], %s2170_s27, %s2170_s27, %s2171_s28  }
  0x17   : > { %s2174_s29 = smov [#allocation8]   ;;  %s2175_s12 = smov 128  }
  0x18   : > { %s350_s30 = sshll.u32 %s2174_s29, 4  ;;  %s2176_s2 = smov 8   ;;  %s351_s30 = int_to_ptr.vmem [resolvable:$true] %s350_s30 }
  0x19   : > { %1968 = dma.hbm_to_vmem [thread:$0]  (!%p2269_p5), %s349_s4, 2048, %s351_s30, [#allocation9], %s2175_s12, %s2175_s12, %s2176_s2  }
  0x1a   : > { %385 = sbr.rel (%p2261_p3) target bundleno = 994 (0x3e2), region = 60 }
  0x1f   : > { %2146 = dma.done.wait (%p2254_p2), [#allocation4], 1024  }
  0x20   : > { %2148 = vsyncadd (%p2254_p2), [#allocation4], 4294966272 }
  0x21   : > { %2150 = dma.done.wait (%p2254_p2), [#allocation6], 2048  }
  0x22   : > { %2152 = vsyncadd (%p2254_p2), [#allocation6], 4294965248 }
  0x23   : > { %2154 = dma.done.wait (%p2254_p2), [#allocation9], 2048  }
  0x24   : > { %2156 = vsyncadd (%p2254_p2), [#allocation9], 4294965248  ;;  %p448_p7 = scmp.lt.s32.totalorder %s2159_s15, 1  ;;  %v2177_v0 = vmov 0   ;;  %v500_v1 = vld [vmem:[%s2900_s3 + $0x70] sm:$0xff]  ;;  %v498_v2 = vld [vmem:[%s2900_s3 + $0x60] sm:$0xff] }
  0x25   : > { %2012 = vset.pattern.permute.xlu2 %v2177_v0  ;;  %2011 = vset.pattern.permute.xlu1 %v2177_v0  ;;  %v496_v3 = vld [vmem:[%s2900_s3 + $0x50] sm:$0xff]  ;;  %v501_v5 = vld [vmem:[%s2900_s3 + $0x78] sm:$0xff]  ;;  %v499_v6 = vld [vmem:[%s2900_s3 + $0x68] sm:$0xff]  ;;  %vm651_vm0 = vcmask 1041408   ;;  %vm626_vm1 = vcmask 31744   ;;  %s468_s21 = sld [smem:[#allocation2]] }
  0x26   : > { %2010 = vset.pattern.permute.xlu0 %v2177_v0  ;;  %s2920_s15 = smov (!%p448_p7, %s2159_s15), 1  ;;  %564 = vperm.xlu1 %2011, %v498_v2   ;;  %v497_v7 = vld [vmem:[%s2900_s3 + $0x58] sm:$0xff]  ;;  %v1914_v12 = vld [vmem:[#allocation3] sm:$0xff]  ;;  %v1919_v13 = vld [vmem:[#allocation3 + $0x28] sm:$0xff] }
  0x27   : > { %s1912_s2 = sshll.u32 %s2920_s15, 2  ;;  %574 = vperm.xlu0 %2010, %v500_v1   ;;  %554 = vperm.xlu2 %2012, %v496_v3   ;;  %v495_v14 = vld [vmem:[%s2900_s3 + $0x48] sm:$0xff]  ;;  %v494_v15 = vld [vmem:[%s2900_s3 + $0x40] sm:$0xff]  ;;  %v492_v16 = vld [vmem:[%s2900_s3 + $0x30] sm:$0xff]  ;;  %s1913_s29 = sshll.u32 %s2920_s15, 3 }
  0x28   : > { %s455_s25 = scalar_lea.vmem %s2898_s1, %s1912_s2  ;;  %v493_v17 = vld [vmem:[%s2900_s3 + $0x38] sm:$0xff]  ;;  %v490_v18 = vld [vmem:[%s2900_s3 + $0x20] sm:$0xff]  ;;  %v491_v19 = vld [vmem:[%s2900_s3 + $0x28] sm:$0xff]  ;;  %s465_s2 = scalar_lea.vmem %s2907_s10, %s1913_s29 }
  0x29   : > { %v469_v4 = vld [vmem:[%s455_s25] sm:$0xf]  ;;  %v1915_v20 = vld [vmem:[#allocation3 + $0x8] sm:$0xff]  ;;  %v1920_v21 = vld [vmem:[#allocation3 + $0x30] sm:$0xff] }
  0x2a   : > { %623 = vst [vmem:[#allocation1] ss:$4 sm:$0xff] %v469_v4  ;;  %v489_v22 = vld [vmem:[%s2900_s3 + $0x18] sm:$0xff]  ;;  %v488_v23 = vld [vmem:[%s2900_s3 + $0x10] sm:$0xff]  ;;  %v486_v24 = vld [vmem:[%s2900_s3] sm:$0xff] }
  0x2b   : > { %v897_v25 = vld [vmem:[%s2902_s5 + $0x70] sm:$0xff]  ;;  %v487_v26 = vld [vmem:[%s2900_s3 + $0x8] sm:$0xff]  ;;  %v898_v27 = vld [vmem:[%s2902_s5 + $0x78] sm:$0xff] }
  0x2c   : > { %v1916_v28 = vld [vmem:[#allocation3 + $0x10] sm:$0xff]  ;;  %v1921_v29 = vld [vmem:[#allocation3 + $0x38] sm:$0xff]  ;;  %v896_v30 = vld [vmem:[%s2902_s5 + $0x68] sm:$0xff] }
  0x2d   : > { %v895_v31 = vld [vmem:[%s2902_s5 + $0x60] sm:$0xff]  ;;  %v893_v32 = vld [vmem:[%s2902_s5 + $0x50] sm:$0xff]  ;;  %v894_v34 = vld [vmem:[%s2902_s5 + $0x58] sm:$0xff] }
  0x2e   : > { %569 = vperm.xlu1 %2011, %v499_v6   ;;  %v891_v33 = vld [vmem:[%s2902_s5 + $0x40] sm:$0xff]  ;;  %v892_v35 = vld [vmem:[%s2902_s5 + $0x48] sm:$0xff]  ;;  %v890_v37 = vld [vmem:[%s2902_s5 + $0x38] sm:$0xff] }
  0x2f   : > { %579 = vperm.xlu0 %2010, %v501_v5   ;;  %559 = vperm.xlu2 %2012, %v497_v7   ;;  %v1917_v36 = vld [vmem:[#allocation3 + $0x18] sm:$0xff]  ;;  %v889_v38 = vld [vmem:[%s2902_s5 + $0x30] sm:$0xff]  ;;  %v888_v41 = vld [vmem:[%s2902_s5 + $0x28] sm:$0xff] }
  0x30   : > { %v887_v39 = vld [vmem:[%s2902_s5 + $0x20] sm:$0xff]  ;;  %v885_v40 = vld [vmem:[%s2902_s5 + $0x10] sm:$0xff]  ;;  %v886_v42 = vld [vmem:[%s2902_s5 + $0x18] sm:$0xff] }
  0x31   : > { %v624_v8 = vld.sshfl [vmem:[#allocation1] sm:$0xff pattern:$0x73625140]  ;;  %v625_v9 = vld.sshfl [vmem:[#allocation1 + $0x8] sm:$0xff pattern:$0x73625140] }
  0x32   : > { %v652_v10 = vsel %vm651_vm0, %v624_v8, 0  ;;  %v654_v11 = vsel %vm651_vm0, %v625_v9, 0  ;;  %v1918_v43 = vld [vmem:[#allocation3 + $0x20] sm:$0xff]  ;;  %v883_v45 = vld [vmem:[%s2902_s5] sm:$0xff]  ;;  %v1267_v46 = vld [vmem:[#allocation8 + $0x70] sm:$0xff] }
  0x33   : > { %663 = vmatpush.bf16.msra.mxu0 %v652_v10  ;;  %1938 = vmatpush.bf16.msra.mxu2 %v652_v10  ;;  %v884_v44 = vld [vmem:[%s2902_s5 + $0x8] sm:$0xff]  ;;  %v1268_v48 = vld [vmem:[#allocation8 + $0x78] sm:$0xff]  ;;  %v1266_v49 = vld [vmem:[#allocation8 + $0x68] sm:$0xff] }
  0x34   : > { %712 = vmatpush.bf16.msra.mxu1 %v654_v11  ;;  %1939 = vmatpush.bf16.msra.mxu3 %v654_v11  ;;  %v1265_v47 = vld [vmem:[#allocation8 + $0x60] sm:$0xff]  ;;  %v1264_v50 = vld [vmem:[#allocation8 + $0x58] sm:$0xff]  ;;  %v1263_v51 = vld [vmem:[#allocation8 + $0x50] sm:$0xff] }
  0x35   : > { %v1261_v52 = vld [vmem:[#allocation8 + $0x40] sm:$0xff]  ;;  %v1259_v53 = vld [vmem:[#allocation8 + $0x30] sm:$0xff]  ;;  %v1262_v54 = vld [vmem:[#allocation8 + $0x48] sm:$0xff] }
  0x36   : > { %1830 = vmatmul.msk.bf16.vlgmr.msra.gmra.mxu0 %vm626_vm1, %v1914_v12  ;;  %1835 = vmatmul.msk.bf16.vlgmr.msra.gmra.mxu2 %vm626_vm1, %v1919_v13  ;;  %v1260_v55 = vld [vmem:[#allocation8 + $0x38] sm:$0xff]  ;;  %v1258_v56 = vld [vmem:[#allocation8 + $0x28] sm:$0xff]  ;;  %v1257_v57 = vld [vmem:[#allocation8 + $0x20] sm:$0xff] }
  0x37   : > { %1838 = vmatmul.msk.bf16.vlgmr.msra.gmra.mxu1 %vm626_vm1, %v1914_v12  ;;  %1843 = vmatmul.msk.bf16.vlgmr.msra.gmra.mxu3 %vm626_vm1, %v1919_v13  ;;  %v1255_v58 = vld [vmem:[#allocation8 + $0x10] sm:$0xff]  ;;  %v1253_v59 = vld [vmem:[#allocation8] sm:$0xff]  ;;  %v1256_v60 = vld [vmem:[#allocation8 + $0x18] sm:$0xff] }
  0x38   : > { %549 = vperm.xlu1 %2011, %v495_v14   ;;  %544 = vperm.xlu0 %2010, %v494_v15   ;;  %v1254_v61 = vld [vmem:[#allocation8 + $0x8] sm:$0xff]  ;;  %v1608_v62 = vld [vmem:[%s2906_s9] sm:$0xf] }
  0x39   : > { %534 = vperm.xlu2 %2012, %v492_v16  }
  0x40   : > { %539 = vperm.xlu0 %2010, %v493_v17   ;;  %524 = vperm.xlu1 %2011, %v490_v18  }
  0x41   : > { %529 = vperm.xlu2 %2012, %v491_v19  }
  0x46   : > { %1831 = vmatmul.msk.bf16.gmra.mxu0 %vm626_vm1, %v1915_v20  ;;  %1836 = vmatmul.msk.bf16.gmra.mxu2 %vm626_vm1, %v1920_v21 }
  0x47   : > { %1839 = vmatmul.msk.bf16.gmra.mxu1 %vm626_vm1, %v1915_v20  ;;  %1844 = vmatmul.msk.bf16.gmra.mxu3 %vm626_vm1, %v1920_v21 }
  0x48   : > { %519 = vperm.xlu1 %2011, %v489_v22   ;;  %514 = vperm.xlu0 %2010, %v488_v23  }
  0x49   : > { %504 = vperm.xlu2 %2012, %v486_v24  }
  0x50   : > { %971 = vperm.xlu1 %2011, %v897_v25   ;;  %509 = vperm.xlu0 %2010, %v487_v26  }
  0x51   : > { %976 = vperm.xlu2 %2012, %v898_v27  }
  0x56   : > { %1832 = vmatmul.msk.bf16.gmra.mxu0 %vm626_vm1, %v1916_v28  ;;  %1837 = vmatmul.msk.bf16.gmra.mxu2 %vm626_vm1, %v1921_v29 }
  0x57   : > { %1840 = vmatmul.msk.bf16.gmra.mxu1 %vm626_vm1, %v1916_v28  ;;  %1845 = vmatmul.msk.bf16.gmra.mxu3 %vm626_vm1, %v1921_v29 }
  0x58   : > { %966 = vperm.xlu1 %2011, %v896_v30   ;;  %961 = vperm.xlu0 %2010, %v895_v31   ;;  %v2456_v31 = vstv %s468_s21 }
  0x59   : > { %951 = vperm.xlu2 %2012, %v893_v32  }
  0x60   : > { %941 = vperm.xlu1 %2011, %v891_v33   ;;  %956 = vperm.xlu0 %2010, %v894_v34  }
  0x61   : > { %946 = vperm.xlu2 %2012, %v892_v35  }
  0x66   : > { %1833 = vmatmul.msk.bf16.gmra.mxu0 %vm626_vm1, %v1917_v36 }
  0x67   : > { %1841 = vmatmul.msk.bf16.gmra.mxu1 %vm626_vm1, %v1917_v36 }
  0x68   : > { %936 = vperm.xlu1 %2011, %v890_v37   ;;  %931 = vperm.xlu0 %2010, %v889_v38  }
  0x69   : > { %921 = vperm.xlu2 %2012, %v887_v39  }
  0x70   : > { %911 = vperm.xlu1 %2011, %v885_v40   ;;  %926 = vperm.xlu0 %2010, %v888_v41  }
  0x71   : > { %916 = vperm.xlu2 %2012, %v886_v42  }
  0x76   : > { %1834 = vmatmul.msk.bf16.gmra.mxu0 %vm626_vm1, %v1918_v43 }
  0x77   : > { %1842 = vmatmul.msk.bf16.gmra.mxu1 %vm626_vm1, %v1918_v43 }
  0x78   : > { %906 = vperm.xlu1 %2011, %v884_v44   ;;  %901 = vperm.xlu0 %2010, %v883_v45  }
  0x79   : > { %1341 = vperm.xlu2 %2012, %v1267_v46  }
  0x80   : > { %1331 = vperm.xlu1 %2011, %v1265_v47   ;;  %1346 = vperm.xlu0 %2010, %v1268_v48  }
  0x81   : > { %1336 = vperm.xlu2 %2012, %v1266_v49   ;;  %v555_v15 = vpop.permute.xlu2 %554 }
  0x88   : > { %1326 = vperm.xlu1 %2011, %v1264_v50   ;;  %1321 = vperm.xlu0 %2010, %v1263_v51  }
  0x89   : > { %1311 = vperm.xlu2 %2012, %v1261_v52   ;;  %v560_v23 = vpop.permute.xlu2 %559 }
  0x90   : > { %1301 = vperm.xlu1 %2011, %v1259_v53   ;;  %1316 = vperm.xlu0 %2010, %v1262_v54  }
  0x91   : > { %1306 = vperm.xlu2 %2012, %v1260_v55  }
  0x93   : > { %v2465_v50 = vpop.permute.xlu2 %534 }
  0x98   : > { %1296 = vperm.xlu1 %2011, %v1258_v56   ;;  %1291 = vperm.xlu0 %2010, %v1257_v57   ;;  %v565_v16 = vpop.permute.xlu1 %564 }
  0x99   : > { %1281 = vperm.xlu2 %2012, %v1255_v58   ;;  %v575_v9 = vpop.permute.xlu0 %574 }
  0xa0   : > { %1271 = vperm.xlu1 %2011, %v1253_v59   ;;  %1286 = vperm.xlu0 %2010, %v1256_v60   ;;  %v570_v25 = vpop.permute.xlu1 %569 }
  0xa1   : > { %1276 = vperm.xlu2 %2012, %v1254_v61   ;;  %v580_v14 = vpop.permute.xlu0 %579 }
  0xa8   : > { %1611 = vperm.xlu0 %2010, %v1608_v62  }
  0xaa   : > { %v2450_v21 = vpop.permute.xlu0 %544  ;;  %v2471_v54 = vpop.permute.xlu1 %549 }
  0xb2   : > { %v2461_v45 = vpop.permute.xlu0 %539 }
  0xb3   : > { %v2430_v63 = vpop.f32.mrf.mxu0 }
  0xb4   : > { %v2432_v0 = vpop.f32.mrf.mxu1 }
  0xb9   : > { %v690_v1 = vpop.f32.mrf.mxu2 }
  0xba   : > { %v739_v2 = vpop.f32.mrf.mxu3  ;;  %v691_v34 = vadd.f32 %v690_v1, %v555_v15 }
  0xbb   : > { %v2434_v3 = vpop.f32.mrf.mxu0  ;;  %v740_v35 = vadd.f32 %v739_v2, %v555_v15 }
  0xbc   : > { %v2436_v4 = vpop.f32.mrf.mxu1  ;;  %v807_v58 = vmul.f32 %v2456_v31, %v691_v34  ;;  %vm774_vm10 = vcmp.gt.f32.partialorder %v691_v34, 0.0 }
  0xbd   : > { %v808_v60 = vmul.f32 %v2456_v31, %v740_v35  ;;  %vm775_vm12 = vcmp.gt.f32.partialorder %v740_v35, 0.0 }
  0xc1   : > { %v692_v5 = vpop.f32.mrf.mxu2 }
  0xc2   : > { %v741_v6 = vpop.f32.mrf.mxu3  ;;  %v693_v37 = vadd.f32 %v692_v5, %v560_v23 }
  0xc3   : > { %v2438_v7 = vpop.f32.mrf.mxu0  ;;  %v742_v41 = vadd.f32 %v741_v6, %v560_v23  ;;  %v2483_v23 = vpop.permute.xlu0 %514 }
  0xc4   : > { %v2440_v8 = vpop.f32.mrf.mxu1  ;;  %v809_v1 = vmul.f32 %v2456_v31, %v693_v37  ;;  %vm776_vm11 = vcmp.gt.f32.partialorder %v693_v37, 0.0 }
  0xc5   : > { %vm777_vm13 = vcmp.gt.f32.partialorder %v742_v41, 0.0 }
  0xc9   : > { %v695_v10 = vpop.f32.mrf.mxu2 }
  0xca   : > { %v744_v11 = vpop.f32.mrf.mxu3  ;;  %v696_v30 = vadd.f32 %v695_v10, %v565_v16 }
  0xcb   : > { %v2442_v12 = vpop.f32.mrf.mxu0  ;;  %v745_v32 = vadd.f32 %v744_v11, %v565_v16 }
  0xcc   : > { %v2444_v13 = vpop.f32.mrf.mxu1  ;;  %v811_v42 = vmul.f32 %v2456_v31, %v696_v30  ;;  %vm778_vm4 = vcmp.gt.f32.partialorder %v696_v30, 0.0 }
  0xcd   : > { %v812_v46 = vmul.f32 %v2456_v31, %v745_v32  ;;  %vm779_vm8 = vcmp.gt.f32.partialorder %v745_v32, 0.0 }
  0xce   : > { %v843_v5 = vsel %vm778_vm4, %v696_v30, %v811_v42  ;;  %v2498_v42 = vadd.f32 %v2438_v7, %v2483_v23 }
  0xcf   : > { %v844_v10 = vsel %vm779_vm8, %v745_v32, %v812_v46 }
  0xd1   : > { %v697_v17 = vpop.f32.mrf.mxu2 }
  0xd2   : > { %v746_v18 = vpop.f32.mrf.mxu3  ;;  %v698_v33 = vadd.f32 %v697_v17, %v570_v25 }
  0xd3   : > { %v2446_v19 = vpop.f32.mrf.mxu0  ;;  %v747_v38 = vadd.f32 %v746_v18, %v570_v25  ;;  %v839_v18 = vsel %vm774_vm10, %v691_v34, %v807_v58 }
  0xd4   : > { %v2448_v20 = vpop.f32.mrf.mxu1  ;;  %v813_v47 = vmul.f32 %v2456_v31, %v698_v33  ;;  %vm780_vm6 = vcmp.gt.f32.partialorder %v698_v33, 0.0 }
  0xd5   : > { %v814_v55 = vmul.f32 %v2456_v31, %v747_v38  ;;  %vm781_vm9 = vcmp.gt.f32.partialorder %v747_v38, 0.0 }
  0xd6   : > { %v845_v6 = vsel %vm780_vm6, %v698_v33, %v813_v47 }
  0xd7   : > { %v846_v11 = vsel %vm781_vm9, %v747_v38, %v814_v55  ;;  %v863_v15 = vpack.c.bf16 %v845_v6, %v843_v5  ;;  %v2485_v38 = vpop.permute.xlu0 %509  ;;  %v720_v6 = vadd.f32 %v2440_v8, %v2483_v23 }
  0xd8   : > { %v864_v17 = vpack.c.bf16 %v846_v11, %v844_v10  ;;  %v717_v8 = vadd.f32 %v2436_v4, %v2485_v38 }
  0xd9   : > { %v700_v22 = vpop.f32.mrf.mxu2 }
  0xda   : > { %v749_v24 = vpop.f32.mrf.mxu3  ;;  %v701_v27 = vadd.f32 %v700_v22, %v575_v9  ;;  %v841_v22 = vsel %vm776_vm11, %v693_v37, %v809_v1 }
  0xdb   : > { %v2452_v26 = vpop.f32.mrf.mxu0  ;;  %v750_v29 = vadd.f32 %v749_v24, %v575_v9  ;;  %v810_v9 = vmul.f32 %v2456_v31, %v742_v41  ;;  %v840_v24 = vsel %vm775_vm12, %v740_v35, %v808_v60  ;;  %v861_v30 = vpack.c.bf16 %v841_v22, %v839_v18 }
  0xdc   : > { %v2454_v28 = vpop.f32.mrf.mxu1  ;;  %v815_v36 = vmul.f32 %v2456_v31, %v701_v27  ;;  %vm782_vm2 = vcmp.gt.f32.partialorder %v701_v27, 0.0  ;;  %vm758_vm12 = vcmp.gt.f32.partialorder %v2498_v42, 0.0 }
  0xdd   : > { %v816_v39 = vmul.f32 %v2456_v31, %v750_v29  ;;  %vm783_vm3 = vcmp.gt.f32.partialorder %v750_v29, 0.0  ;;  %v842_v25 = vsel %vm777_vm13, %v742_v41, %v810_v9  ;;  %vm759_vm13 = vcmp.gt.f32.partialorder %v720_v6, 0.0 }
  0xde   : > { %v847_v53 = vsel %vm782_vm2, %v701_v27, %v815_v36  ;;  %v530_v27 = vpop.permute.xlu2 %529  ;;  %v862_v32 = vpack.c.bf16 %v842_v25, %v840_v24  ;;  %v791_v24 = vmul.f32 %v2456_v31, %v2498_v42 }
  0xdf   : > { %v848_v57 = vsel %vm783_vm3, %v750_v29, %v816_v39  ;;  %v525_v29 = vpop.permute.xlu1 %524 }
  0xe0   : > { %v2510_v47 = vadd.f32 %v2448_v20, %v525_v29 }
  0xe1   : > { %v702_v40 = vpop.f32.mrf.mxu2 }
  0xe2   : > { %v703_v43 = vadd.f32 %v702_v40, %v580_v14  ;;  %v751_v44 = vpop.f32.mrf.mxu3  ;;  %v796_v11 = vmul.f32 %v2456_v31, %v2510_v47  ;;  %vm763_vm9 = vcmp.gt.f32.partialorder %v2510_v47, 0.0 }
  0xe3   : > { %v752_v48 = vadd.f32 %v751_v44, %v580_v14  ;;  %v680_v49 = vpop.f32.mrf.mxu0 }
  0xe4   : > { %v817_v51 = vmul.f32 %v2456_v31, %v703_v43  ;;  %v2468_v52 = vpop.f32.mrf.mxu1  ;;  %vm784_vm5 = vcmp.gt.f32.partialorder %v703_v43, 0.0  ;;  %v681_v40 = vadd.f32 %v680_v49, %v2465_v50  ;;  %v727_v49 = vadd.f32 %v2454_v28, %v530_v27 }
  0xe5   : > { %v818_v56 = vmul.f32 %v2456_v31, %v752_v48  ;;  %vm785_vm7 = vcmp.gt.f32.partialorder %v752_v48, 0.0  ;;  %v828_v4 = vsel %vm763_vm9, %v2510_v47, %v796_v11 }
  0xe6   : > { %v849_v59 = vsel %vm784_vm5, %v703_v43, %v817_v51  ;;  %v2487_v39 = vpop.permute.xlu2 %504  ;;  %v2502_v43 = vadd.f32 %v2434_v3, %v2485_v38  ;;  %v730_v3 = vadd.f32 %v2468_v52, %v2465_v50  ;;  %vm766_vm3 = vcmp.gt.f32.partialorder %v681_v40, 0.0 }
  0xe7   : > { %v865_v61 = vpack.c.bf16 %v849_v59, %v847_v53  ;;  %v850_v62 = vsel %vm785_vm7, %v752_v48, %v818_v56  ;;  %v2492_v37 = vadd.f32 %v2430_v63, %v2487_v39  ;;  %v520_v35 = vpop.permute.xlu1 %519  ;;  %v676_v63 = vadd.f32 %v2446_v19, %v525_v29 }
  0xe8   : > { %v866_v2 = vpack.c.bf16 %v850_v62, %v848_v57  ;;  %v2505_v44 = vadd.f32 %v2442_v12, %v520_v35  ;;  %v799_v19 = vmul.f32 %v2456_v31, %v681_v40  ;;  %v800_v57 = vmul.f32 %v2456_v31, %v730_v3 }
  0xe9   : > { %1027 = vmatpush.bf16.msrb.mxu2 %v865_v61  ;;  %vm767_vm5 = vcmp.gt.f32.partialorder %v730_v3, 0.0  ;;  %v722_v1 = vadd.f32 %v2444_v13, %v520_v35  ;;  %v795_v9 = vmul.f32 %v2456_v31, %v676_v63  ;;  %vm765_vm7 = vcmp.gt.f32.partialorder %v727_v49, 0.0 }
  0xea   : > { %1076 = vmatpush.bf16.msrb.mxu3 %v866_v2  ;;  %v798_v2 = vmul.f32 %v2456_v31, %v727_v49  ;;  %v831_v10 = vsel %vm766_vm3, %v681_v40, %v799_v19  ;;  %vm762_vm8 = vcmp.gt.f32.partialorder %v676_v63, 0.0  ;;  %v793_v13 = vmul.f32 %v2456_v31, %v2505_v44 }
  0xeb   : > { %v682_v14 = vpop.f32.mrf.mxu0  ;;  %v794_v18 = vmul.f32 %v2456_v31, %v722_v1  ;;  %vm760_vm10 = vcmp.gt.f32.partialorder %v2505_v44, 0.0  ;;  %v715_v23 = vadd.f32 %v2432_v0, %v2487_v39  ;;  %v827_v25 = vsel %vm762_vm8, %v676_v63, %v795_v9 }
  0xec   : > { %v731_v16 = vpop.f32.mrf.mxu1  ;;  %v683_v46 = vadd.f32 %v682_v14, %v2461_v45  ;;  %v830_v22 = vsel %vm765_vm7, %v727_v49, %v798_v2  ;;  %vm761_vm11 = vcmp.gt.f32.partialorder %v722_v1, 0.0  ;;  %v790_v0 = vmul.f32 %v2456_v31, %v717_v8  ;;  %v1924_v49 = vld [vmem:[#allocation5 + $0x10] sm:$0xff] }
  0xed   : > { %1028 = vmatpush.bf16.msrb.mxu2 %v863_v15  ;;  %v732_v48 = vadd.f32 %v731_v16, %v2461_v45  ;;  %v832_v15 = vsel %vm767_vm5, %v730_v3, %v800_v57  ;;  %v787_v38 = vmul.f32 %v2456_v31, %v2492_v37  ;;  %v823_v39 = vsel %vm758_vm12, %v2498_v42, %v791_v24  ;;  %v1922_v42 = vld [vmem:[#allocation5] sm:$0xff] }
  0xee   : > { %1077 = vmatpush.bf16.msrb.mxu3 %v864_v17  ;;  %vm768_vm2 = vcmp.gt.f32.partialorder %v683_v46, 0.0  ;;  %v1926_v3 = vld [vmem:[#allocation5 + $0x20] sm:$0xff] }
  0xef   : > { %v802_v28 = vmul.f32 %v2456_v31, %v732_v48  ;;  %vm769_vm4 = vcmp.gt.f32.partialorder %v732_v48, 0.0 }
  0xf1   : > { %1029 = vmatpush.bf16.msrb.mxu2 %v861_v30  ;;  %v834_v5 = vsel %vm769_vm4, %v732_v48, %v802_v28  ;;  %v789_v30 = vmul.f32 %v2456_v31, %v2502_v43 }
  0xf2   : > { %1078 = vmatpush.bf16.msrb.mxu3 %v862_v32  ;;  %v858_v16 = vpack.c.bf16 %v834_v5, %v832_v15  ;;  %v856_v32 = vpack.c.bf16 %v830_v22, %v828_v4 }
  0xf3   : > { %v685_v33 = vpop.f32.mrf.mxu0 }
  0xf4   : > { %v734_v36 = vpop.f32.mrf.mxu1  ;;  %v686_v34 = vadd.f32 %v685_v33, %v2450_v21  ;;  %v825_v33 = vsel %vm760_vm10, %v2505_v44, %v793_v13 }
  0xf5   : > { %v735_v41 = vadd.f32 %v734_v36, %v2450_v21  ;;  %v678_v21 = vadd.f32 %v2452_v26, %v530_v27  ;;  %v801_v26 = vmul.f32 %v2456_v31, %v683_v46  ;;  %v792_v27 = vmul.f32 %v2456_v31, %v720_v6 }
  0xf6   : > { %v803_v12 = vmul.f32 %v2456_v31, %v686_v34  ;;  %vm770_vm14 = vcmp.gt.f32.partialorder %v686_v34, 0.0  ;;  %v826_v36 = vsel %vm761_vm11, %v722_v1, %v794_v18  ;;  %v853_v35 = vpack.c.bf16 %v825_v33, %v823_v39 }
  0xf7   : > { %v804_v20 = vmul.f32 %v2456_v31, %v735_v41  ;;  %vm771_vm0 = vcmp.gt.f32.partialorder %v735_v41, 0.0  ;;  %v797_v60 = vmul.f32 %v2456_v31, %v678_v21  ;;  %v833_v62 = vsel %vm768_vm2, %v683_v46, %v801_v26 }
  0xf8   : > { %v835_v52 = vsel %vm770_vm14, %v686_v34, %v803_v12  ;;  %vm764_vm6 = vcmp.gt.f32.partialorder %v678_v21, 0.0  ;;  %v857_v14 = vpack.c.bf16 %v833_v62, %v831_v10  ;;  %vm756_vm14 = vcmp.gt.f32.partialorder %v2502_v43, 0.0  ;;  %v2562_v12 = vpop.permute.xlu1 %971 }
  0xf9   : > { %v836_v58 = vsel %vm771_vm0, %v735_v41, %v804_v20  ;;  %v829_v17 = vsel %vm764_vm6, %v678_v21, %v797_v60  ;;  %v788_v34 = vmul.f32 %v2456_v31, %v715_v23  ;;  %v824_v40 = vsel %vm759_vm13, %v720_v6, %v792_v27 }
  0xfa   : > { %v855_v29 = vpack.c.bf16 %v829_v17, %v827_v25  ;;  %vm754_vm0 = vcmp.gt.f32.partialorder %v2492_v37, 0.0  ;;  %v854_v41 = vpack.c.bf16 %v826_v36, %v824_v40  ;;  %v821_v44 = vsel %vm756_vm14, %v2502_v43, %v789_v30  ;;  %v1925_v43 = vld [vmem:[#allocation5 + $0x18] sm:$0xff] }
  0xfb   : > { %v687_v7 = vpop.f32.mrf.mxu0  ;;  %v819_v63 = vsel %vm754_vm0, %v2492_v37, %v787_v38  ;;  %v1927_v37 = vld [vmem:[#allocation5 + $0x28] sm:$0xff] }
  0xfc   : > { %v688_v51 = vadd.f32 %v687_v7, %v2471_v54  ;;  %v736_v53 = vpop.f32.mrf.mxu1  ;;  %v851_v47 = vpack.c.bf16 %v821_v44, %v819_v63  ;;  %v1923_v7 = vld [vmem:[#allocation5 + $0x8] sm:$0xff] }
  0xfd   : > { %v737_v55 = vadd.f32 %v736_v53, %v2471_v54  ;;  %v2564_v53 = vpop.permute.xlu0 %961 }
  0xfe   : > { %v805_v45 = vmul.f32 %v2456_v31, %v688_v51  ;;  %vm772_vm15 = vcmp.gt.f32.partialorder %v688_v51, 0.0 }
  0xff   : > { %v806_v50 = vmul.f32 %v2456_v31, %v737_v55  ;;  %vm773_vm1 = vcmp.gt.f32.partialorder %v737_v55, 0.0 }
 0x100   : > { %v837_v56 = vsel %vm772_vm15, %v688_v51, %v805_v45  ;;  %vm757_vm15 = vcmp.gt.f32.partialorder %v717_v8, 0.0  ;;  %v1928_v51 = vld [vmem:[#allocation5 + $0x30] sm:$0xff]  ;;  %v2566_v19 = vpop.permute.xlu1 %966  ;;  %v2572_v45 = vpop.permute.xlu2 %976 }
 0x101   : > { %v859_v54 = vpack.c.bf16 %v837_v56, %v835_v52  ;;  %v838_v59 = vsel %vm773_vm1, %v737_v55, %v806_v50  ;;  %vm755_vm1 = vcmp.gt.f32.partialorder %v715_v23, 0.0  ;;  %v822_v46 = vsel %vm757_vm15, %v717_v8, %v790_v0  ;;  %v1929_v55 = vld [vmem:[#allocation5 + $0x38] sm:$0xff] }
 0x102   : > { %v860_v61 = vpack.c.bf16 %v838_v59, %v836_v58  ;;  %v820_v21 = vsel %vm755_vm1, %v715_v23, %v788_v34 }
 0x103   : > { %1030 = vmatpush.bf16.msrb.mxu2 %v859_v54  ;;  %v852_v48 = vpack.c.bf16 %v822_v46, %v820_v21 }
 0x104   : > { %1079 = vmatpush.bf16.msrb.mxu3 %v860_v61 }
 0x105   : > { %v2568_v20 = vpop.permute.xlu0 %956 }
 0x107   : > { %1031 = vmatpush.bf16.msrb.mxu2 %v857_v14 }
 0x108   : > { %1080 = vmatpush.bf16.msrb.mxu3 %v858_v16  ;;  %v2570_v26 = vpop.permute.xlu1 %941  ;;  %v2578_v52 = vpop.permute.xlu2 %951 }
 0x10b   : > { %1032 = vmatpush.bf16.msrb.mxu2 %v855_v29 }
 0x10c   : > { %1081 = vmatpush.bf16.msrb.mxu3 %v856_v32 }
 0x10d   : > { %v2574_v28 = vpop.permute.xlu0 %931 }
 0x10f   : > { %1033 = vmatpush.bf16.msrb.mxu2 %v853_v35 }
 0x110   : > { %1082 = vmatpush.bf16.msrb.mxu3 %v854_v41  ;;  %v2576_v50 = vpop.permute.xlu1 %936  ;;  %v2580_v59 = vpop.permute.xlu2 %946 }
 0x113   : > { %1034 = vmatpush.bf16.msrb.mxu2 %v851_v47 }
 0x114   : > { %1083 = vmatpush.bf16.msrb.mxu3 %v852_v48 }
 0x115   : > { %v927_v56 = vpop.permute.xlu0 %926 }
 0x116   : > { %1035 = vmatmul.bf16.vlgmr.msrb.gmra.mxu2 %v1922_v42 }
 0x117   : > { %1084 = vmatmul.bf16.vlgmr.msrb.gmra.mxu3 %v1922_v42 }
 0x118   : > { %v912_v57 = vpop.permute.xlu1 %911  ;;  %v922_v17 = vpop.permute.xlu2 %921 }
 0x11d   : > { %v902_v60 = vpop.permute.xlu0 %901 }
 0x120   : > { %v907_v1 = vpop.permute.xlu1 %906  ;;  %v917_v4 = vpop.permute.xlu2 %916 }
 0x126   : > { %1040 = vmatmul.bf16.gmra.mxu2 %v1923_v7 }
 0x127   : > { %1089 = vmatmul.bf16.gmra.mxu3 %v1923_v7 }
 0x136   : > { %1045 = vmatmul.bf16.gmra.mxu2 %v1924_v49 }
 0x137   : > { %1094 = vmatmul.bf16.gmra.mxu3 %v1924_v49 }
 0x146   : > { %1050 = vmatmul.bf16.gmra.mxu2 %v1925_v43 }
 0x147   : > { %1099 = vmatmul.bf16.gmra.mxu3 %v1925_v43 }
 0x156   : > { %1055 = vmatmul.bf16.gmra.mxu2 %v1926_v3 }
 0x157   : > { %1104 = vmatmul.bf16.gmra.mxu3 %v1926_v3 }
 0x166   : > { %1060 = vmatmul.bf16.gmra.mxu2 %v1927_v37 }
 0x167   : > { %1109 = vmatmul.bf16.gmra.mxu3 %v1927_v37 }
 0x176   : > { %1065 = vmatmul.bf16.gmra.mxu2 %v1928_v51 }
 0x177   : > { %1114 = vmatmul.bf16.gmra.mxu3 %v1928_v51 }
 0x186   : > { %1070 = vmatmul.bf16.gmra.mxu2 %v1929_v55 }
 0x187   : > { %1119 = vmatmul.bf16.gmra.mxu3 %v1929_v55 }
 0x199   : > { %v1036_v54 = vpop.f32.mrf.mxu2 }
 0x19a   : > { %v1085_v58 = vpop.f32.mrf.mxu3  ;;  %v1037_v61 = vadd.f32 %v1036_v54, %v902_v60 }
 0x19b   : > { %v1086_v62 = vadd.f32 %v1085_v58, %v902_v60 }
 0x19c   : > { %v1157_v5 = vmul.f32 %v1037_v61, %v2456_v31  ;;  %vm1125_vm2 = vcmp.gt.f32.partialorder %v1037_v61, 0.0 }
 0x19d   : > { %v1158_v10 = vmul.f32 %v1086_v62, %v2456_v31  ;;  %vm1126_vm4 = vcmp.gt.f32.partialorder %v1086_v62, 0.0 }
 0x19e   : > { %v2586_v13 = vsel %vm1125_vm2, %v1037_v61, %v1157_v5 }
 0x19f   : > { %v2592_v18 = vsel %vm1126_vm4, %v1086_v62, %v1158_v10 }
 0x1a1   : > { %v1038_v2 = vpop.f32.mrf.mxu2 }
 0x1a2   : > { %v1039_v6 = vadd.f32 %v1038_v2, %v907_v1  ;;  %v1087_v9 = vpop.f32.mrf.mxu3 }
 0x1a3   : > { %v1088_v11 = vadd.f32 %v1087_v9, %v907_v1 }
 0x1a4   : > { %v1159_v14 = vmul.f32 %v1039_v6, %v2456_v31  ;;  %vm1127_vm3 = vcmp.gt.f32.partialorder %v1039_v6, 0.0 }
 0x1a5   : > { %v1160_v15 = vmul.f32 %v1088_v11, %v2456_v31  ;;  %vm1128_vm5 = vcmp.gt.f32.partialorder %v1088_v11, 0.0 }
 0x1a6   : > { %v2588_v16 = vsel %vm1127_vm3, %v1039_v6, %v1159_v14 }
 0x1a7   : > { %v1221_v8 = vpack.c.bf16 %v2588_v16, %v2586_v13  ;;  %v2594_v22 = vsel %vm1128_vm5, %v1088_v11, %v1160_v15  ;;  %v1935_v13 = vld [vmem:[#allocation7 + $0x28] sm:$0xff]  ;;  %v2717_v16 = vpop.permute.xlu2 %1341 }
 0x1a8   : > { %v1222_v23 = vpack.c.bf16 %v2594_v22, %v2592_v18  ;;  %v1936_v18 = vld [vmem:[#allocation7 + $0x30] sm:$0xff] }
 0x1a9   : > { %v1041_v24 = vpop.f32.mrf.mxu2 }
 0x1aa   : > { %v1090_v25 = vpop.f32.mrf.mxu3  ;;  %v1042_v27 = vadd.f32 %v1041_v24, %v912_v57 }
 0x1ab   : > { %v1091_v29 = vadd.f32 %v1090_v25, %v912_v57 }
 0x1ac   : > { %v1161_v32 = vmul.f32 %v1042_v27, %v2456_v31  ;;  %vm1129_vm6 = vcmp.gt.f32.partialorder %v1042_v27, 0.0 }
 0x1ad   : > { %v1162_v36 = vmul.f32 %v1091_v29, %v2456_v31  ;;  %vm1130_vm8 = vcmp.gt.f32.partialorder %v1091_v29, 0.0 }
 0x1ae   : > { %v2602_v35 = vsel %vm1129_vm6, %v1042_v27, %v1161_v32 }
 0x1af   : > { %v2608_v44 = vsel %vm1130_vm8, %v1091_v29, %v1162_v36  ;;  %v2721_v22 = vpop.permute.xlu2 %1336 }
 0x1b1   : > { %v1043_v30 = vpop.f32.mrf.mxu2 }
 0x1b2   : > { %v1044_v33 = vadd.f32 %v1043_v30, %v917_v4  ;;  %v1092_v0 = vpop.f32.mrf.mxu3 }
 0x1b3   : > { %v1093_v38 = vadd.f32 %v1092_v0, %v917_v4 }
 0x1b4   : > { %v1163_v39 = vmul.f32 %v1044_v33, %v2456_v31  ;;  %vm1131_vm7 = vcmp.gt.f32.partialorder %v1044_v33, 0.0 }
 0x1b5   : > { %v1164_v34 = vmul.f32 %v1093_v38, %v2456_v31  ;;  %vm1132_vm9 = vcmp.gt.f32.partialorder %v1093_v38, 0.0 }
 0x1b6   : > { %v2604_v40 = vsel %vm1131_vm7, %v1044_v33, %v1163_v39 }
 0x1b7   : > { %v1223_v41 = vpack.c.bf16 %v2604_v40, %v2602_v35  ;;  %v2610_v46 = vsel %vm1132_vm9, %v1093_v38, %v1164_v34  ;;  %v1932_v35 = vld [vmem:[#allocation7 + $0x10] sm:$0xff]  ;;  %v1933_v40 = vld [vmem:[#allocation7 + $0x18] sm:$0xff] }
 0x1b8   : > { %v1224_v63 = vpack.c.bf16 %v2610_v46, %v2608_v44  ;;  %v2725_v44 = vpop.permute.xlu2 %1311  ;;  %v1937_v46 = vld [vmem:[#allocation7 + $0x38] sm:$0xff] }
 0x1b9   : > { %v1046_v47 = vpop.f32.mrf.mxu2 }
 0x1ba   : > { %v1095_v21 = vpop.f32.mrf.mxu3  ;;  %v1047_v48 = vadd.f32 %v1046_v47, %v922_v17 }
 0x1bb   : > { %v1096_v42 = vadd.f32 %v1095_v21, %v922_v17 }
 0x1bc   : > { %v1165_v49 = vmul.f32 %v1047_v48, %v2456_v31  ;;  %vm1133_vm10 = vcmp.gt.f32.partialorder %v1047_v48, 0.0 }
 0x1bd   : > { %v1166_v37 = vmul.f32 %v1096_v42, %v2456_v31  ;;  %vm1134_vm12 = vcmp.gt.f32.partialorder %v1096_v42, 0.0 }
 0x1be   : > { %v2618_v54 = vsel %vm1133_vm10, %v1047_v48, %v1165_v49 }
 0x1bf   : > { %v2624_v61 = vsel %vm1134_vm12, %v1096_v42, %v1166_v37 }
 0x1c1   : > { %v1048_v7 = vpop.f32.mrf.mxu2 }
 0x1c2   : > { %v1049_v43 = vadd.f32 %v1048_v7, %v927_v56  ;;  %v1097_v3 = vpop.f32.mrf.mxu3 }
 0x1c3   : > { %v1098_v51 = vadd.f32 %v1097_v3, %v927_v56 }
 0x1c4   : > { %v1167_v55 = vmul.f32 %v1049_v43, %v2456_v31  ;;  %vm1135_vm11 = vcmp.gt.f32.partialorder %v1049_v43, 0.0 }
 0x1c5   : > { %v1168_v57 = vmul.f32 %v1098_v51, %v2456_v31  ;;  %vm1136_vm13 = vcmp.gt.f32.partialorder %v1098_v51, 0.0 }
 0x1c6   : > { %v2620_v58 = vsel %vm1135_vm11, %v1049_v43, %v1167_v55 }
 0x1c7   : > { %v1225_v60 = vpack.c.bf16 %v2620_v58, %v2618_v54  ;;  %v2626_v62 = vsel %vm1136_vm13, %v1098_v51, %v1168_v57  ;;  %v1931_v54 = vld [vmem:[#allocation7 + $0x8] sm:$0xff] }
 0x1c8   : > { %v1226_v56 = vpack.c.bf16 %v2626_v62, %v2624_v61 }
 0x1c9   : > { %v1051_v1 = vpop.f32.mrf.mxu2 }
 0x1ca   : > { %v1100_v2 = vpop.f32.mrf.mxu3  ;;  %v1052_v5 = vadd.f32 %v1051_v1, %v2574_v28 }
 0x1cb   : > { %v1101_v6 = vadd.f32 %v1100_v2, %v2574_v28 }
 0x1cc   : > { %v1169_v10 = vmul.f32 %v1052_v5, %v2456_v31  ;;  %vm1137_vm14 = vcmp.gt.f32.partialorder %v1052_v5, 0.0 }
 0x1cd   : > { %v1170_v15 = vmul.f32 %v1101_v6, %v2456_v31  ;;  %vm1138_vm0 = vcmp.gt.f32.partialorder %v1101_v6, 0.0 }
 0x1ce   : > { %v2638_v27 = vsel %vm1137_vm14, %v1052_v5, %v1169_v10 }
 0x1cf   : > { %v2644_v4 = vsel %vm1138_vm0, %v1101_v6, %v1170_v15 }
 0x1d1   : > { %v1053_v9 = vpop.f32.mrf.mxu2 }
 0x1d2   : > { %v1054_v11 = vadd.f32 %v1053_v9, %v2576_v50  ;;  %v1102_v14 = vpop.f32.mrf.mxu3 }
 0x1d3   : > { %v1103_v17 = vadd.f32 %v1102_v14, %v2576_v50 }
 0x1d4   : > { %v1171_v24 = vmul.f32 %v1054_v11, %v2456_v31  ;;  %vm1139_vm15 = vcmp.gt.f32.partialorder %v1054_v11, 0.0 }
 0x1d5   : > { %v1172_v25 = vmul.f32 %v1103_v17, %v2456_v31  ;;  %vm1140_vm1 = vcmp.gt.f32.partialorder %v1103_v17, 0.0 }
 0x1d6   : > { %v2640_v28 = vsel %vm1139_vm15, %v1054_v11, %v1171_v24 }
 0x1d7   : > { %v1227_v29 = vpack.c.bf16 %v2640_v28, %v2638_v27  ;;  %v2646_v30 = vsel %vm1140_vm1, %v1103_v17, %v1172_v25  ;;  %v1930_v27 = vld [vmem:[#allocation7] sm:$0xff] }
 0x1d8   : > { %v1228_v50 = vpack.c.bf16 %v2646_v30, %v2644_v4 }
 0x1d9   : > { %v1056_v32 = vpop.f32.mrf.mxu2 }
 0x1da   : > { %v1105_v33 = vpop.f32.mrf.mxu3  ;;  %v2654_v55 = vadd.f32 %v1056_v32, %v2570_v26 }
 0x1dc   : > { %vm1141_vm0 = vcmp.gt.f32.partialorder %v2654_v55, 0.0 }
 0x1e1   : > { %v1058_v0 = vpop.f32.mrf.mxu2 }
 0x1e2   : > { %v1107_v36 = vpop.f32.mrf.mxu3  ;;  %v2657_v57 = vadd.f32 %v1058_v0, %v2580_v59 }
 0x1e4   : > { %vm1143_vm14 = vcmp.gt.f32.partialorder %v2657_v57, 0.0 }
 0x1e9   : > { %v1061_v38 = vpop.f32.mrf.mxu2 }
 0x1ea   : > { %v1110_v39 = vpop.f32.mrf.mxu3  ;;  %v1062_v2 = vadd.f32 %v1061_v38, %v2578_v52 }
 0x1eb   : > { %v1111_v5 = vadd.f32 %v1110_v39, %v2578_v52 }
 0x1ec   : > { %vm1145_vm12 = vcmp.gt.f32.partialorder %v1062_v2, 0.0 }
 0x1ed   : > { %vm1146_vm13 = vcmp.gt.f32.partialorder %v1111_v5, 0.0 }
 0x1f1   : > { %v1063_v34 = vpop.f32.mrf.mxu2 }
 0x1f2   : > { %v1112_v47 = vpop.f32.mrf.mxu3  ;;  %v1064_v6 = vadd.f32 %v1063_v34, %v2568_v20 }
 0x1f3   : > { %v1113_v11 = vadd.f32 %v1112_v47, %v2568_v20 }
 0x1f4   : > { %vm1147_vm10 = vcmp.gt.f32.partialorder %v1064_v6, 0.0 }
 0x1f5   : > { %vm1148_vm11 = vcmp.gt.f32.partialorder %v1113_v11, 0.0 }
 0x1f9   : > { %v1066_v21 = vpop.f32.mrf.mxu2 }
 0x1fa   : > { %v1115_v48 = vpop.f32.mrf.mxu3  ;;  %v1067_v37 = vadd.f32 %v1066_v21, %v2564_v53  ;;  %v1179_v21 = vmul.f32 %v1064_v6, %v2456_v31 }
 0x1fc   : > { %v1181_v24 = vmul.f32 %v1067_v37, %v2456_v31  ;;  %vm1149_vm7 = vcmp.gt.f32.partialorder %v1067_v37, 0.0 }
 0x201   : > { %v1068_v42 = vpop.f32.mrf.mxu2 }
 0x202   : > { %v1117_v7 = vpop.f32.mrf.mxu3  ;;  %v1069_v1 = vadd.f32 %v1068_v42, %v2566_v19 }
 0x203   : > { %v1118_v9 = vadd.f32 %v1117_v7, %v2566_v19  ;;  %v1108_v7 = vadd.f32 %v1107_v36, %v2580_v59  ;;  %v1175_v59 = vmul.f32 %v2657_v57, %v2456_v31 }
 0x204   : > { %v1183_v32 = vmul.f32 %v1069_v1, %v2456_v31  ;;  %vm1151_vm6 = vcmp.gt.f32.partialorder %v1069_v1, 0.0 }
 0x205   : > { %vm1152_vm8 = vcmp.gt.f32.partialorder %v1118_v9, 0.0  ;;  %vm1144_vm15 = vcmp.gt.f32.partialorder %v1108_v7, 0.0 }
 0x206   : > { %v1215_v42 = vsel %vm1151_vm6, %v1069_v1, %v1183_v32 }
 0x209   : > { %v1071_v49 = vpop.f32.mrf.mxu2 }
 0x20a   : > { %v1120_v43 = vpop.f32.mrf.mxu3  ;;  %v1072_v3 = vadd.f32 %v1071_v49, %v2562_v12  ;;  %v1180_v49 = vmul.f32 %v1113_v11, %v2456_v31 }
 0x20b   : > { %v1121_v51 = vadd.f32 %v1120_v43, %v2562_v12  ;;  %v1116_v12 = vadd.f32 %v1115_v48, %v2564_v53  ;;  %v1184_v53 = vmul.f32 %v1118_v9, %v2456_v31 }
 0x20c   : > { %v1185_v14 = vmul.f32 %v1072_v3, %v2456_v31  ;;  %vm1153_vm2 = vcmp.gt.f32.partialorder %v1072_v3, 0.0 }
 0x20d   : > { %v1186_v25 = vmul.f32 %v1121_v51, %v2456_v31  ;;  %vm1154_vm4 = vcmp.gt.f32.partialorder %v1121_v51, 0.0  ;;  %v1182_v39 = vmul.f32 %v1116_v12, %v2456_v31  ;;  %vm1150_vm9 = vcmp.gt.f32.partialorder %v1116_v12, 0.0 }
 0x20e   : > { %v1217_v0 = vsel %vm1153_vm2, %v1072_v3, %v1185_v14  ;;  %v1216_v43 = vsel %vm1152_vm8, %v1118_v9, %v1184_v53  ;;  %v1106_v3 = vadd.f32 %v1105_v33, %v2570_v26  ;;  %v1178_v14 = vmul.f32 %v1111_v5, %v2456_v31 }
 0x20f   : > { %v1218_v34 = vsel %vm1154_vm4, %v1121_v51, %v1186_v25  ;;  %v1213_v51 = vsel %vm1149_vm7, %v1067_v37, %v1181_v24  ;;  %v1214_v1 = vsel %vm1150_vm9, %v1116_v12, %v1182_v39  ;;  %v1176_v9 = vmul.f32 %v1108_v7, %v2456_v31 }
 0x210   : > { %v1234_v36 = vpack.c.bf16 %v1216_v43, %v1214_v1  ;;  %v1212_v26 = vsel %vm1148_vm11, %v1113_v11, %v1180_v49  ;;  %v1173_v33 = vmul.f32 %v2654_v55, %v2456_v31  ;;  %v1174_v12 = vmul.f32 %v1106_v3, %v2456_v31 }
 0x211   : > { %v1073_v10 = vpop.f32.mrf.mxu2  ;;  %v1210_v25 = vsel %vm1146_vm13, %v1111_v5, %v1178_v14  ;;  %vm1142_vm1 = vcmp.gt.f32.partialorder %v1106_v3, 0.0  ;;  %v1208_v11 = vsel %vm1144_vm15, %v1108_v7, %v1176_v9 }
 0x212   : > { %v1074_v15 = vadd.f32 %v1073_v10, %v2572_v45  ;;  %v1122_v17 = vpop.f32.mrf.mxu3  ;;  %v1177_v10 = vmul.f32 %v1062_v2, %v2456_v31  ;;  %v1205_v32 = vsel %vm1141_vm0, %v2654_v55, %v1173_v33  ;;  %v1206_v53 = vsel %vm1142_vm1, %v1106_v3, %v1174_v12 }
 0x213   : > { %v1123_v52 = vadd.f32 %v1122_v17, %v2572_v45  ;;  %v1211_v17 = vsel %vm1147_vm10, %v1064_v6, %v1179_v21  ;;  %v1232_v6 = vpack.c.bf16 %v1212_v26, %v1210_v25 }
 0x214   : > { %v1187_v19 = vmul.f32 %v1074_v15, %v2456_v31  ;;  %vm1155_vm3 = vcmp.gt.f32.partialorder %v1074_v15, 0.0  ;;  %v1209_v37 = vsel %vm1145_vm12, %v1062_v2, %v1177_v10 }
 0x215   : > { %v1188_v20 = vmul.f32 %v1123_v52, %v2456_v31  ;;  %vm1156_vm5 = vcmp.gt.f32.partialorder %v1123_v52, 0.0  ;;  %v1231_v24 = vpack.c.bf16 %v1211_v17, %v1209_v37 }
 0x216   : > { %v1219_v38 = vsel %vm1155_vm3, %v1074_v15, %v1187_v19  ;;  %v1233_v15 = vpack.c.bf16 %v1215_v42, %v1213_v51 }
 0x217   : > { %v1235_v45 = vpack.c.bf16 %v1219_v38, %v1217_v0  ;;  %v1220_v47 = vsel %vm1156_vm5, %v1123_v52, %v1188_v20  ;;  %v1207_v52 = vsel %vm1143_vm14, %v2657_v57, %v1175_v59  ;;  %v1230_v20 = vpack.c.bf16 %v1208_v11, %v1206_v53 }
 0x218   : > { %v1236_v48 = vpack.c.bf16 %v1220_v47, %v1218_v34  ;;  %v1229_v19 = vpack.c.bf16 %v1207_v52, %v1205_v32 }
 0x219   : > { %1397 = vmatpush.bf16.msrb.mxu0 %v1235_v45 }
 0x21a   : > { %1446 = vmatpush.bf16.msrb.mxu1 %v1236_v48 }
 0x21d   : > { %1398 = vmatpush.bf16.msrb.mxu0 %v1233_v15 }
 0x21e   : > { %1447 = vmatpush.bf16.msrb.mxu1 %v1234_v36 }
 0x221   : > { %1399 = vmatpush.bf16.msrb.mxu0 %v1231_v24 }
 0x222   : > { %1448 = vmatpush.bf16.msrb.mxu1 %v1232_v6 }
 0x225   : > { %1400 = vmatpush.bf16.msrb.mxu0 %v1229_v19 }
 0x226   : > { %1449 = vmatpush.bf16.msrb.mxu1 %v1230_v20 }
 0x229   : > { %1401 = vmatpush.bf16.msrb.mxu0 %v1227_v29 }
 0x22a   : > { %1450 = vmatpush.bf16.msrb.mxu1 %v1228_v50 }
 0x22d   : > { %1402 = vmatpush.bf16.msrb.mxu0 %v1225_v60  ;;  %v2731_v60 = vpop.permute.xlu2 %1306 }
 0x22e   : > { %1451 = vmatpush.bf16.msrb.mxu1 %v1226_v56 }
 0x231   : > { %1403 = vmatpush.bf16.msrb.mxu0 %v1223_v41  ;;  %v1934_v41 = vld [vmem:[#allocation7 + $0x20] sm:$0xff] }
 0x232   : > { %1452 = vmatpush.bf16.msrb.mxu1 %v1224_v63  ;;  %v2727_v63 = vpop.permute.xlu0 %1346 }
 0x235   : > { %1404 = vmatpush.bf16.msrb.mxu0 %v1221_v8  ;;  %v2719_v8 = vpop.permute.xlu1 %1331  ;;  %v1282_v56 = vpop.permute.xlu2 %1281 }
 0x236   : > { %1453 = vmatpush.bf16.msrb.mxu1 %v1222_v23 }
 0x238   : > { %1405 = vmatmul.bf16.vlgmr.msrb.gmra.mxu0 %v1930_v27 }
 0x239   : > { %1454 = vmatmul.bf16.vlgmr.msrb.gmra.mxu1 %v1930_v27 }
 0x23a   : > { %v2733_v61 = vpop.permute.xlu0 %1321 }
 0x23d   : > { %v2723_v23 = vpop.permute.xlu1 %1326  ;;  %v1277_v57 = vpop.permute.xlu2 %1276 }
 0x242   : > { %v2735_v4 = vpop.permute.xlu0 %1316 }
 0x245   : > { %v2729_v58 = vpop.permute.xlu1 %1301 }
 0x248   : > { %1410 = vmatmul.bf16.gmra.mxu0 %v1931_v54 }
 0x249   : > { %1459 = vmatmul.bf16.gmra.mxu1 %v1931_v54 }
 0x24a   : > { %v1292_v42 = vpop.permute.xlu0 %1291 }
 0x24d   : > { %v1297_v62 = vpop.permute.xlu1 %1296 }
 0x252   : > { %v1287_v1 = vpop.permute.xlu0 %1286 }
 0x255   : > { %v1272_v30 = vpop.permute.xlu1 %1271 }
 0x258   : > { %1415 = vmatmul.bf16.gmra.mxu0 %v1932_v35 }
 0x259   : > { %1464 = vmatmul.bf16.gmra.mxu1 %v1932_v35 }
 0x268   : > { %1420 = vmatmul.bf16.gmra.mxu0 %v1933_v40 }
 0x269   : > { %1469 = vmatmul.bf16.gmra.mxu1 %v1933_v40 }
 0x278   : > { %1425 = vmatmul.bf16.gmra.mxu0 %v1934_v41 }
 0x279   : > { %1474 = vmatmul.bf16.gmra.mxu1 %v1934_v41 }
 0x288   : > { %1430 = vmatmul.bf16.gmra.mxu0 %v1935_v13 }
 0x289   : > { %1479 = vmatmul.bf16.gmra.mxu1 %v1935_v13 }
 0x298   : > { %1435 = vmatmul.bf16.gmra.mxu0 %v1936_v18 }
 0x299   : > { %1484 = vmatmul.bf16.gmra.mxu1 %v1936_v18 }
 0x2a8   : > { %1440 = vmatmul.bf16.gmra.mxu0 %v1937_v46 }
 0x2a9   : > { %1489 = vmatmul.bf16.gmra.mxu1 %v1937_v46 }
 0x2b5   : > { %v1406_v28 = vpop.f32.mrf.mxu0 }
 0x2b6   : > { %v1455_v29 = vpop.f32.mrf.mxu1  ;;  %v1407_v50 = vadd.f32 %v1406_v28, %v1272_v30 }
 0x2b7   : > { %v1456_v55 = vadd.f32 %v1455_v29, %v1272_v30 }
 0x2b8   : > { %v1527_v5 = vmul.f32 %v1407_v50, %v2456_v31  ;;  %vm1495_vm2 = vcmp.gt.f32.partialorder %v1407_v50, 0.0 }
 0x2b9   : > { %v1528_v39 = vmul.f32 %v1456_v55, %v2456_v31  ;;  %vm1496_vm3 = vcmp.gt.f32.partialorder %v1456_v55, 0.0 }
 0x2ba   : > { %v2741_v21 = vsel %vm1495_vm2, %v1407_v50, %v1527_v5 }
 0x2bb   : > { %v2747_v49 = vsel %vm1496_vm3, %v1456_v55, %v1528_v39 }
 0x2bd   : > { %v1408_v2 = vpop.f32.mrf.mxu0 }
 0x2be   : > { %v1409_v0 = vadd.f32 %v1408_v2, %v1277_v57  ;;  %v1457_v38 = vpop.f32.mrf.mxu1 }
 0x2bf   : > { %v1458_v45 = vadd.f32 %v1457_v38, %v1277_v57 }
 0x2c0   : > { %vm1497_vm4 = vcmp.gt.f32.partialorder %v1409_v0, 0.0  ;;  %v1529_v34 = vmul.f32 %v1409_v0, %v2456_v31 }
 0x2c1   : > { %vm1498_vm5 = vcmp.gt.f32.partialorder %v1458_v45, 0.0  ;;  %v1530_v47 = vmul.f32 %v1458_v45, %v2456_v31 }
 0x2c2   : > { %v2743_v48 = vsel %vm1497_vm4, %v1409_v0, %v1529_v34 }
 0x2c3   : > { %v1591_v7 = vpack.c.bf16 %v2743_v48, %v2741_v21  ;;  %v2749_v43 = vsel %vm1498_vm5, %v1458_v45, %v1530_v47 }
 0x2c4   : > { %v1592_v3 = vpack.c.bf16 %v2749_v43, %v2747_v49 }
 0x2c5   : > { %v1411_v10 = vpop.f32.mrf.mxu0 }
 0x2c6   : > { %v1460_v51 = vpop.f32.mrf.mxu1  ;;  %v1412_v14 = vadd.f32 %v1411_v10, %v1282_v56 }
 0x2c7   : > { %v1461_v15 = vadd.f32 %v1460_v51, %v1282_v56 }
 0x2c8   : > { %v1531_v36 = vmul.f32 %v1412_v14, %v2456_v31  ;;  %vm1499_vm6 = vcmp.gt.f32.partialorder %v1412_v14, 0.0 }
 0x2c9   : > { %v1532_v26 = vmul.f32 %v1461_v15, %v2456_v31  ;;  %vm1500_vm7 = vcmp.gt.f32.partialorder %v1461_v15, 0.0 }
 0x2ca   : > { %v2757_v24 = vsel %vm1499_vm6, %v1412_v14, %v1531_v36 }
 0x2cb   : > { %v2763_v52 = vsel %vm1500_vm7, %v1461_v15, %v1532_v26 }
 0x2cd   : > { %v1413_v59 = vpop.f32.mrf.mxu0 }
 0x2ce   : > { %v1414_v17 = vadd.f32 %v1413_v59, %v1287_v1  ;;  %v1462_v9 = vpop.f32.mrf.mxu1 }
 0x2cf   : > { %v1463_v33 = vadd.f32 %v1462_v9, %v1287_v1 }
 0x2d0   : > { %vm1501_vm8 = vcmp.gt.f32.partialorder %v1414_v17, 0.0  ;;  %v1533_v37 = vmul.f32 %v1414_v17, %v2456_v31 }
 0x2d1   : > { %vm1502_vm9 = vcmp.gt.f32.partialorder %v1463_v33, 0.0  ;;  %v1534_v12 = vmul.f32 %v1463_v33, %v2456_v31 }
 0x2d2   : > { %v2759_v25 = vsel %vm1501_vm8, %v1414_v17, %v1533_v37 }
 0x2d3   : > { %v1593_v6 = vpack.c.bf16 %v2759_v25, %v2757_v24  ;;  %v2765_v11 = vsel %vm1502_vm9, %v1463_v33, %v1534_v12  ;;  %v1612_v24 = vpop.permute.xlu0 %1611 }
 0x2d4   : > { %v1594_v32 = vpack.c.bf16 %v2765_v11, %v2763_v52 }
 0x2d5   : > { %v1416_v19 = vpop.f32.mrf.mxu0 }
 0x2d6   : > { %v1465_v53 = vpop.f32.mrf.mxu1  ;;  %v1417_v20 = vadd.f32 %v1416_v19, %v1292_v42 }
 0x2d7   : > { %v1466_v27 = vadd.f32 %v1465_v53, %v1292_v42 }
 0x2d8   : > { %v1535_v35 = vmul.f32 %v1417_v20, %v2456_v31  ;;  %vm1503_vm10 = vcmp.gt.f32.partialorder %v1417_v20, 0.0 }
 0x2d9   : > { %v1536_v13 = vmul.f32 %v1466_v27, %v2456_v31  ;;  %vm1504_vm11 = vcmp.gt.f32.partialorder %v1466_v27, 0.0 }
 0x2da   : > { %v2773_v28 = vsel %vm1503_vm10, %v1417_v20, %v1535_v35 }
 0x2db   : > { %v2779_v50 = vsel %vm1504_vm11, %v1466_v27, %v1536_v13 }
 0x2dd   : > { %v1418_v54 = vpop.f32.mrf.mxu0 }
 0x2de   : > { %v1419_v40 = vadd.f32 %v1418_v54, %v1297_v62  ;;  %v1467_v41 = vpop.f32.mrf.mxu1 }
 0x2df   : > { %v1468_v18 = vadd.f32 %v1467_v41, %v1297_v62 }
 0x2e0   : > { %vm1505_vm12 = vcmp.gt.f32.partialorder %v1419_v40, 0.0  ;;  %v1537_v46 = vmul.f32 %v1419_v40, %v2456_v31 }
 0x2e1   : > { %vm1506_vm13 = vcmp.gt.f32.partialorder %v1468_v18, 0.0  ;;  %v1538_v56 = vmul.f32 %v1468_v18, %v2456_v31 }
 0x2e2   : > { %v2775_v29 = vsel %vm1505_vm12, %v1419_v40, %v1537_v46 }
 0x2e3   : > { %v1595_v30 = vpack.c.bf16 %v2775_v29, %v2773_v28  ;;  %v2781_v55 = vsel %vm1506_vm13, %v1468_v18, %v1538_v56  ;;  %v1607_v28 = vld [vmem:[%s2905_s8] sm:$0x3] }
 0x2e4   : > { %v1596_v62 = vpack.c.bf16 %v2781_v55, %v2779_v50 }
 0x2e5   : > { %v1421_v57 = vpop.f32.mrf.mxu0 }
 0x2e6   : > { %v1470_v2 = vpop.f32.mrf.mxu1  ;;  %v1422_v5 = vadd.f32 %v1421_v57, %v2729_v58 }
 0x2e7   : > { %v1471_v0 = vadd.f32 %v1470_v2, %v2729_v58 }
 0x2e8   : > { %v1539_v39 = vmul.f32 %v1422_v5, %v2456_v31  ;;  %vm1507_vm14 = vcmp.gt.f32.partialorder %v1422_v5, 0.0 }
 0x2e9   : > { %v1540_v47 = vmul.f32 %v1471_v0, %v2456_v31  ;;  %vm1508_vm15 = vcmp.gt.f32.partialorder %v1471_v0, 0.0 }
 0x2ea   : > { %v2793_v14 = vsel %vm1507_vm14, %v1422_v5, %v1539_v39 }
 0x2eb   : > { %v2799_v1 = vsel %vm1508_vm15, %v1471_v0, %v1540_v47 }
 0x2ed   : > { %v1423_v38 = vpop.f32.mrf.mxu0 }
 0x2ee   : > { %v1424_v45 = vadd.f32 %v1423_v38, %v2731_v60  ;;  %v1472_v34 = vpop.f32.mrf.mxu1 }
 0x2ef   : > { %v1473_v42 = vadd.f32 %v1472_v34, %v2731_v60 }
 0x2f0   : > { %vm1509_vm0 = vcmp.gt.f32.partialorder %v1424_v45, 0.0  ;;  %v1541_v10 = vmul.f32 %v1424_v45, %v2456_v31 }
 0x2f1   : > { %vm1510_vm1 = vcmp.gt.f32.partialorder %v1473_v42, 0.0  ;;  %v1542_v51 = vmul.f32 %v1473_v42, %v2456_v31 }
 0x2f2   : > { %v2795_v58 = vsel %vm1509_vm0, %v1424_v45, %v1541_v10 }
 0x2f3   : > { %v1597_v15 = vpack.c.bf16 %v2795_v58, %v2793_v14  ;;  %v2801_v59 = vsel %vm1510_vm1, %v1473_v42, %v1542_v51 }
 0x2f4   : > { %v1598_v60 = vpack.c.bf16 %v2801_v59, %v2799_v1 }
 0x2f5   : > { %v1426_v36 = vpop.f32.mrf.mxu0 }
 0x2f6   : > { %v1475_v17 = vpop.f32.mrf.mxu1  ;;  %v2809_v46 = vadd.f32 %v1426_v36, %v2725_v44 }
 0x2f8   : > { %vm1511_vm0 = vcmp.gt.f32.partialorder %v2809_v46, 0.0 }
 0x2fd   : > { %v1428_v9 = vpop.f32.mrf.mxu0 }
 0x2fe   : > { %v1477_v26 = vpop.f32.mrf.mxu1  ;;  %v2812_v56 = vadd.f32 %v1428_v9, %v2735_v4 }
 0x300   : > { %vm1513_vm14 = vcmp.gt.f32.partialorder %v2812_v56, 0.0 }
 0x305   : > { %v1431_v33 = vpop.f32.mrf.mxu0 }
 0x306   : > { %v1480_v37 = vpop.f32.mrf.mxu1  ;;  %v1432_v2 = vadd.f32 %v1431_v33, %v2733_v61 }
 0x307   : > { %v2817_v5 = vadd.f32 %v1480_v37, %v2733_v61 }
 0x308   : > { %vm1515_vm12 = vcmp.gt.f32.partialorder %v1432_v2, 0.0 }
 0x309   : > { %vm1516_vm13 = vcmp.gt.f32.partialorder %v2817_v5, 0.0 }
 0x30d   : > { %v1433_v12 = vpop.f32.mrf.mxu0 }
 0x30e   : > { %v1482_v19 = vpop.f32.mrf.mxu1  ;;  %v1434_v0 = vadd.f32 %v1433_v12, %v2723_v23 }
 0x310   : > { %vm1517_vm10 = vcmp.gt.f32.partialorder %v1434_v0, 0.0 }
 0x315   : > { %v1436_v53 = vpop.f32.mrf.mxu0 }
 0x316   : > { %v1485_v20 = vpop.f32.mrf.mxu1  ;;  %v1437_v13 = vadd.f32 %v1436_v53, %v2719_v8  ;;  %v1549_v53 = vmul.f32 %v1434_v0, %v2456_v31 }
 0x317   : > { %v1486_v45 = vadd.f32 %v1485_v20, %v2719_v8 }
 0x318   : > { %vm1519_vm2 = vcmp.gt.f32.partialorder %v1437_v13, 0.0  ;;  %v1551_v36 = vmul.f32 %v1437_v13, %v2456_v31 }
 0x319   : > { %v1552_v37 = vmul.f32 %v1486_v45, %v2456_v31  ;;  %vm1520_vm9 = vcmp.gt.f32.partialorder %v1486_v45, 0.0 }
 0x31d   : > { %v1438_v27 = vpop.f32.mrf.mxu0 }
 0x31e   : > { %v1487_v54 = vpop.f32.mrf.mxu1  ;;  %v1439_v57 = vadd.f32 %v1438_v27, %v2721_v22 }
 0x31f   : > { %v1488_v38 = vadd.f32 %v1487_v54, %v2721_v22  ;;  %v1478_v54 = vadd.f32 %v1477_v26, %v2735_v4  ;;  %v1584_v4 = vsel %vm1520_vm9, %v1486_v45, %v1552_v37  ;;  %v1545_v26 = vmul.f32 %v2812_v56, %v2456_v31 }
 0x320   : > { %v1553_v51 = vmul.f32 %v1439_v57, %v2456_v31  ;;  %vm1521_vm6 = vcmp.gt.f32.partialorder %v1439_v57, 0.0 }
 0x321   : > { %v1554_v8 = vmul.f32 %v1488_v38, %v2456_v31  ;;  %vm1522_vm8 = vcmp.gt.f32.partialorder %v1488_v38, 0.0  ;;  %vm1514_vm15 = vcmp.gt.f32.partialorder %v1478_v54, 0.0 }
 0x322   : > { %v1585_v27 = vsel %vm1521_vm6, %v1439_v57, %v1553_v51  ;;  %v1577_v51 = vsel %vm1513_vm14, %v2812_v56, %v1545_v26 }
 0x325   : > { %v1441_v35 = vpop.f32.mrf.mxu0 }
 0x326   : > { %v1490_v40 = vpop.f32.mrf.mxu1  ;;  %v1442_v41 = vadd.f32 %v1441_v35, %v2717_v16 }
 0x327   : > { %v1491_v18 = vadd.f32 %v1490_v40, %v2717_v16  ;;  %v1483_v16 = vadd.f32 %v1482_v19, %v2723_v23  ;;  %v1586_v40 = vsel %vm1522_vm8, %v1488_v38, %v1554_v8 }
 0x328   : > { %v1555_v34 = vmul.f32 %v1442_v41, %v2456_v31  ;;  %vm1523_vm3 = vcmp.gt.f32.partialorder %v1442_v41, 0.0  ;;  %v1604_v38 = vpack.c.bf16 %v1586_v40, %v1584_v4 }
 0x329   : > { %v1556_v10 = vmul.f32 %v1491_v18, %v2456_v31  ;;  %vm1524_vm4 = vcmp.gt.f32.partialorder %v1491_v18, 0.0  ;;  %v1550_v35 = vmul.f32 %v1483_v16, %v2456_v31  ;;  %vm1518_vm11 = vcmp.gt.f32.partialorder %v1483_v16, 0.0 }
 0x32a   : > { %v1587_v9 = vsel %vm1523_vm3, %v1442_v41, %v1555_v34  ;;  %v1476_v41 = vadd.f32 %v1475_v17, %v2725_v44  ;;  %v1548_v34 = vmul.f32 %v2817_v5, %v2456_v31  ;;  %v1581_v44 = vsel %vm1517_vm10, %v1434_v0, %v1549_v53 }
 0x32b   : > { %v1546_v17 = vmul.f32 %v1478_v54, %v2456_v31 }
 0x32c   : > { %vm1512_vm1 = vcmp.gt.f32.partialorder %v1476_v41, 0.0 }
 0x32d   : > { %v1443_v39 = vpop.f32.mrf.mxu0 }
 0x32e   : > { %v1444_v47 = vadd.f32 %v1443_v39, %v2727_v63  ;;  %v1492_v42 = vpop.f32.mrf.mxu1  ;;  %v1547_v39 = vmul.f32 %v1432_v2, %v2456_v31 }
 0x32f   : > { %v1493_v61 = vadd.f32 %v1492_v42, %v2727_v63  ;;  %v1588_v63 = vsel %vm1524_vm4, %v1491_v18, %v1556_v10  ;;  %v1583_v18 = vsel %vm1519_vm2, %v1437_v13, %v1551_v36  ;;  %v1582_v13 = vsel %vm1518_vm11, %v1483_v16, %v1550_v35 }
 0x330   : > { %vm1525_vm5 = vcmp.gt.f32.partialorder %v1444_v47, 0.0  ;;  %v1557_v22 = vmul.f32 %v1444_v47, %v2456_v31  ;;  %v1603_v57 = vpack.c.bf16 %v1585_v27, %v1583_v18  ;;  %v1579_v45 = vsel %vm1515_vm12, %v1432_v2, %v1547_v39 }
 0x331   : > { %vm1526_vm7 = vcmp.gt.f32.partialorder %v1493_v61, 0.0  ;;  %v1558_v23 = vmul.f32 %v1493_v61, %v2456_v31  ;;  %v1544_v42 = vmul.f32 %v1476_v41, %v2456_v31  ;;  %v1601_v10 = vpack.c.bf16 %v1581_v44, %v1579_v45 }
 0x332   : > { %v1589_v33 = vsel %vm1525_vm5, %v1444_v47, %v1557_v22  ;;  %v1543_v47 = vmul.f32 %v2809_v46, %v2456_v31  ;;  %v1578_v22 = vsel %vm1514_vm15, %v1478_v54, %v1546_v17  ;;  %vm1649_vm4 = vcmask 1043456  }
 0x333   : > { %v1605_v12 = vpack.c.bf16 %v1589_v33, %v1587_v9  ;;  %v1590_v19 = vsel %vm1526_vm7, %v1493_v61, %v1558_v23  ;;  %v1580_v61 = vsel %vm1516_vm13, %v2817_v5, %v1548_v34  ;;  %v1576_v23 = vsel %vm1512_vm1, %v1476_v41, %v1544_v42 }
 0x334   : > { %v1606_v20 = vpack.c.bf16 %v1590_v19, %v1588_v63  ;;  %v1602_v0 = vpack.c.bf16 %v1582_v13, %v1580_v61  ;;  %v1575_v16 = vsel %vm1511_vm0, %v2809_v46, %v1543_v47  ;;  %v1600_v36 = vpack.c.bf16 %v1578_v22, %v1576_v23 }
 0x335   : > { %1614 = vmatpush.bf16.msra.mxu2 %v1605_v12  ;;  %v1599_v8 = vpack.c.bf16 %v1577_v51, %v1575_v16 }
 0x336   : > { %1627 = vmatpush.bf16.msra.mxu3 %v1606_v20 }
 0x339   : > { %1615 = vmatpush.bf16.msra.mxu2 %v1603_v57 }
 0x33a   : > { %1628 = vmatpush.bf16.msra.mxu3 %v1604_v38 }
 0x33d   : > { %1616 = vmatpush.bf16.msra.mxu2 %v1601_v10 }
 0x33e   : > { %1629 = vmatpush.bf16.msra.mxu3 %v1602_v0 }
 0x341   : > { %1617 = vmatpush.bf16.msra.mxu2 %v1599_v8 }
 0x342   : > { %1630 = vmatpush.bf16.msra.mxu3 %v1600_v36 }
 0x345   : > { %1618 = vmatpush.bf16.msra.mxu2 %v1597_v15 }
 0x346   : > { %1631 = vmatpush.bf16.msra.mxu3 %v1598_v60 }
 0x349   : > { %1619 = vmatpush.bf16.msra.mxu2 %v1595_v30 }
 0x34a   : > { %1632 = vmatpush.bf16.msra.mxu3 %v1596_v62 }
 0x34d   : > { %1620 = vmatpush.bf16.msra.mxu2 %v1593_v6 }
 0x34e   : > { %1633 = vmatpush.bf16.msra.mxu3 %v1594_v32 }
 0x351   : > { %1621 = vmatpush.bf16.msra.mxu2 %v1591_v7 }
 0x352   : > { %1634 = vmatpush.bf16.msra.mxu3 %v1592_v3 }
 0x354   : > { %1622 = vmatmul.bf16.vlgmr.msra.gmra.mxu2 %v1607_v28 }
 0x355   : > { %1635 = vmatmul.bf16.vlgmr.msra.gmra.mxu3 %v1607_v28 }
 0x3d7   : > { %v1623_v25 = vpop.f32.mrf.mxu2 }
 0x3d8   : > { %v1624_v6 = vadd.f32 %v1623_v25, %v1612_v24  ;;  %v1636_v29 = vpop.f32.mrf.mxu3 }
 0x3d9   : > { %v1637_v52 = vadd.f32 %v1636_v29, %v1612_v24 }
 0x3da   : > { %v1642_v11 = vmul.f32 %v1624_v6, %v2456_v31  ;;  %vm1640_vm3 = vcmp.gt.f32.partialorder %v1624_v6, 0.0 }
 0x3db   : > { %vm1641_vm2 = vcmp.gt.f32.partialorder %v1637_v52, 0.0  ;;  %v1643_v21 = vmul.f32 %v1637_v52, %v2456_v31 }
 0x3dc   : > { %v1644_v49 = vsel %vm1640_vm3, %v1624_v6, %v1642_v11 }
 0x3dd   : > { %v1645_v48 = vsel %vm1641_vm2, %v1637_v52, %v1643_v21 }
 0x3de   : > { %v1648_v7 = vrot.slane %v1645_v48, 4 }
 0x3df   : > { %v1625_v43 = vpop.f32.mrf.mxu2 }
 0x3e0   : > { %v1650_v3 = vsel %vm1649_vm4, %v1644_v49, %v1648_v7  ;;  %v1638_v32 = vpop.f32.mrf.mxu3 }
 0x3e1   : > { %1652 = vst [vmem:[%s465_s2] sm:$0xff] %v1650_v3 }
 0x3e2 PF: > { %s24_s17 = sadd.s32 1, %s2167_s17   ;;  %s2915_s15 = smov %s2163_s16 }
 0x3e3   : > { %p21_p8 = scmp.ge.s32.totalorder %s24_s17, 4   ;;  %s2916_s16 = smov %s2918_s26 }
 0x3e5   :  { %23 = sbr.rel (!%p21_p8) target bundleno = 8 (0x8), region = 107 }
 0x3ea   :  { %1683 = vsyncpa [#allocation4], 1 }
 0x3eb   :  { %1685 = vsyncpa [#allocation4 + $0x1], 1 }
 0x3ec   :  { %1686 = vsyncpa [#allocation6], 1 }
 0x3ed   :  { %1687 = vsyncpa [#allocation9], 1 }

</bundles_post_ra>
